<compile_context>
chip_gen: v7x
topology: tpu7x:2x2x1
jax: 0.10.0
libtpu: 0.0.40
codegen_flags: <defaults>
</compile_context>

<pallas_src>
import math
import numpy as np

import jax
import jax.numpy as jnp
from jax.experimental import pallas as pl
from jax.experimental.pallas import tpu as pltpu


def mamba_kernel(x_ref, w_in_ref, convw_ref, convb_ref, w_xp_ref, w_dt_ref,
                 b_dt_ref, a_t_ref, d_vec_ref, w_out_ref, out_ref, y_sc):
    B, L, D = out_ref.shape
    LB = L * B

    x = x_ref[...]                                    # (LB, D) f32, time-major rows

    # ---- fused in_proj: one (LB, D) x (D, 2D) MXU pass (bf16 in, f32 acc) ----
    xr = jnp.dot(x.astype(jnp.bfloat16), w_in_ref[...],
                 preferred_element_type=jnp.float32)  # (LB, 2D)
    xi = xr[:, :D]                                    # "x" half
    res = xr[:, D:]                                   # "res" half

    # ---- depthwise causal Conv1d (pad once, K static taps) + bias + SiLU ----
    K = convw_ref.shape[0]
    xpad = jnp.concatenate(
        [jnp.zeros(((K - 1) * B, D), jnp.float32), xi], axis=0)  # ((L+K-1)*B, D)
    acc = jnp.broadcast_to(convb_ref[0][None, :], (LB, D))
    for k in range(K):                                # K tiny & static
        xs = xi if k == K - 1 else xpad[k * B: k * B + LB, :]
        acc = acc + xs * convw_ref[k][None, :]
    xc = acc * jax.nn.sigmoid(acc)                    # SiLU, f32

    # ---- fused x_proj -> (delta_r | B | C), then dt_proj + softplus ----
    R = w_dt_ref.shape[0]                             # dt_rank
    N = a_t_ref.shape[0]                              # d_state
    xdbl = jnp.dot(xc.astype(jnp.bfloat16), w_xp_ref[...],
                   preferred_element_type=jnp.float32)            # (LB, R+2N)
    delta = jax.nn.softplus(
        jnp.dot(xdbl[:, :R].astype(jnp.bfloat16), w_dt_ref[...],
                preferred_element_type=jnp.float32)
        + b_dt_ref[0][None, :])                       # (LB, D) f32

    # ---- selective scan: hoist all exp / broadcasts out of the serial loop ----
    a_t = a_t_ref[...]                                # (N, D) == (-exp(A_log)).T
    dA = [jnp.exp(delta * a_t[n: n + 1, :]) for n in range(N)]       # (LB, D) each
    dB = [delta * xdbl[:, R + n: R + n + 1] for n in range(N)]       # (LB, D) each
    Cb = [jnp.broadcast_to(xdbl[:, R + N + n: R + N + n + 1], (LB, D))
          for n in range(N)]                                          # (LB, D) each

    s = [jnp.zeros((B, D), jnp.float32) for _ in range(N)]
    for i in range(L):                                # L small & static: unroll
        lo = i * B
        y_i = None
        for n in range(N):                            # recurrence: one FMA per state dim
            s[n] = dA[n][lo:lo + B, :] * s[n] + dB[n][lo:lo + B, :]
            t = s[n] * Cb[n][lo:lo + B, :]
            y_i = t if y_i is None else y_i + t
        y_sc[lo:lo + B, :] = y_i                      # lane-dense (B, 128) store

    # ---- skip connection, gate with SiLU(res), fused out_proj ----
    y = y_sc[...] + xc * d_vec_ref[0][None, :]
    y = y * (res * jax.nn.sigmoid(res))
    out_flat = jnp.dot(y.astype(jnp.bfloat16), w_out_ref[...],
                       preferred_element_type=jnp.float32)            # (LB, D)

    # de-interleave time-major rows into the (B, L, D) output block (static stores)
    for i in range(L):
        for b in range(B):
            r = i * B + b
            out_ref[b, i:i + 1, :] = out_flat[r:r + 1, :]


@jax.jit
def mamba_block_pallas(x_lbd, kp):
    """x_lbd: (L, B, d_model) as in the PyTorch module.  Returns (B, L, d_model)."""
    L, B, D = x_lbd.shape
    x_flat = x_lbd.astype(jnp.float32).reshape(L * B, D)   # free reshape, time-major
    weights = [kp['w_in'], kp['conv_w'], kp['conv_b'], kp['w_xp'], kp['w_dt'],
               kp['b_dt'], kp['a_t'], kp['d_vec'], kp['w_out']]
    w_specs = [pl.BlockSpec(w.shape, lambda i: (0, 0)) for w in weights]  # all 2D
    return pl.pallas_call(
        mamba_kernel,
        out_shape=jax.ShapeDtypeStruct((B, L, D), jnp.float32),
        grid=(1,),                                    # batch folded into one step
        in_specs=[pl.BlockSpec((L * B, D), lambda i: (0, 0))] + w_specs,
        out_specs=pl.BlockSpec((B, L, D), lambda i: (0, 0, 0)),
        scratch_shapes=[pltpu.VMEM((L * B, D), jnp.float32)],
        compiler_params=pltpu.CompilerParams(dimension_semantics=("arbitrary",)),
    )(x_flat, *weights)


def init_params(key, d_model=128, d_conv=4, d_state=2, dt_rank=None):
    """Deterministic synthetic parameters, shapes matching MambaBlock.__init__."""
    if dt_rank is None:
        dt_rank = math.ceil(d_model / 16)
    ks = jax.random.split(key, 9)
    s_in = 1.0 / math.sqrt(d_model)
    s_dt = 1.0 / math.sqrt(dt_rank)
    u = lambda k, shape, s: jax.random.uniform(k, shape, jnp.float32, -s, s)
    p = {}
    # in_proj.weight.T split into the two d_model halves
    p['win_x'] = u(ks[0], (d_model, d_model), s_in)
    p['win_r'] = u(ks[1], (d_model, d_model), s_in)
    # conv1d: depthwise weight (d_model, 1, d_conv) stored as (d_conv, d_model)
    p['conv_w'] = u(ks[2], (d_conv, d_model), 0.5)
    p['conv_b'] = u(ks[3], (1, d_model), 0.5)
    # x_proj.weight.T split into dt_rank / B / C columns
    p['wdelta'] = u(ks[4], (d_model, dt_rank), s_in)
    p['wb'] = u(ks[5], (d_model, d_state), s_in)
    p['wc'] = u(ks[6], (d_model, d_state), s_in)
    # dt_proj
    p['wdt'] = u(ks[7], (dt_rank, d_model), s_dt)
    p['bdt'] = u(ks[8], (1, d_model), s_dt)
    # A_log = log(repeat(arange(1, n+1)));  kernel uses A^T with the minus folded in
    A_log = jnp.log(jnp.broadcast_to(
        jnp.arange(1, d_state + 1, dtype=jnp.float32)[None, :], (d_model, d_state)))
    p['a_t'] = (-jnp.exp(A_log)).T                        # (d_state, d_model)
    p['dvec'] = jnp.ones((1, d_model), jnp.float32)       # D = ones(d_model)
    p['wout'] = u(jax.random.fold_in(key, 99), (d_model, d_model), s_in)
    return p


def pack_params(p):
    """Fuse / cast module parameters into the layout the kernel expects."""
    bf = jnp.bfloat16
    f32 = jnp.float32
    return dict(
        w_in=jnp.concatenate([p['win_x'], p['win_r']], axis=1).astype(bf),       # (D, 2D)
        conv_w=p['conv_w'].astype(f32),                                          # (K, D)
        conv_b=p['conv_b'].astype(f32),                                          # (1, D)
        w_xp=jnp.concatenate([p['wdelta'], p['wb'], p['wc']], axis=1).astype(bf),  # (D, R+2N)
        w_dt=p['wdt'].astype(bf),                                                # (R, D)
        b_dt=p['bdt'].astype(f32),                                               # (1, D)
        a_t=p['a_t'].astype(f32),                                                # (N, D)
        d_vec=p['dvec'].astype(f32),                                             # (1, D)
        w_out=p['wout'].astype(bf),                                              # (D, D)
    )


def mamba_ref(x_lbd, p):
    """Pure-JAX f32 reference of the PyTorch forward, for correctness checking."""
    x = jnp.transpose(x_lbd, (1, 0, 2)).astype(jnp.float32)
    B, L, D = x.shape
    xi = x @ p['win_x']
    res = x @ p['win_r']
    K = p['conv_w'].shape[0]
    pad = jnp.pad(xi, ((0, 0), (K - 1, 0), (0, 0)))
    conv = p['conv_b'][0]
    for k in range(K):
        conv = conv + pad[:, k:k + L, :] * p['conv_w'][k]
    xc = conv * jax.nn.sigmoid(conv)
    delta_r = xc @ p['wdelta']
    Bm = xc @ p['wb']
    Cm = xc @ p['wc']
    delta = jax.nn.softplus(delta_r @ p['wdt'] + p['bdt'][0])
    A_t = p['a_t']                                        # (N, D)
    N = A_t.shape[0]
    s = jnp.zeros((B, N, D), jnp.float32)
    ys = []
    for i in range(L):
        d_i = delta[:, i][:, None, :]                     # (B, 1, D)
        dA = jnp.exp(d_i * A_t[None])
        dB = d_i * Bm[:, i][:, :, None]
        s = dA * s + dB
        ys.append(jnp.sum(s * Cm[:, i][:, :, None], axis=1))
    y = jnp.stack(ys, axis=1)                             # (B, L, D)
    y = y + xc * p['dvec'][0]
    y = y * (res * jax.nn.sigmoid(res))
    return y @ p['wout']


if __name__ == "__main__":
    d_model, d_conv, d_state = 128, 4, 2                  # module defaults
    L, B = 16, 2                                          # small seq / batch
    key = jax.random.PRNGKey(0)
    kx, kp = jax.random.split(key)
    x = jax.random.normal(kx, (L, B, d_model), jnp.float32)   # module input (L, B, D)
    params = init_params(kp, d_model, d_conv, d_state)
    kparams = pack_params(params)

    out = jax.block_until_ready(mamba_block_pallas(x, kparams))
    ref = jax.block_until_ready(mamba_ref(x, params))

    assert out.shape == (B, L, d_model)
    np.testing.assert_allclose(np.asarray(out), np.asarray(ref), rtol=2e-2, atol=2e-2)
    print("KERNEL_OK")
</pallas_src>

<mosaic_0001>
module attributes {stable_mosaic.version = 11 : i64} {
  func.func @mamba_kernel(%arg0: i32, %arg1: memref<32x128xf32, #tpu.memory_space<vmem>>, %arg2: memref<128x256xbf16, #tpu.memory_space<vmem>>, %arg3: memref<4x128xf32, #tpu.memory_space<vmem>>, %arg4: memref<1x128xf32, #tpu.memory_space<vmem>>, %arg5: memref<128x12xbf16, #tpu.memory_space<vmem>>, %arg6: memref<8x128xbf16, #tpu.memory_space<vmem>>, %arg7: memref<1x128xf32, #tpu.memory_space<vmem>>, %arg8: memref<2x128xf32, #tpu.memory_space<vmem>>, %arg9: memref<1x128xf32, #tpu.memory_space<vmem>>, %arg10: memref<128x128xbf16, #tpu.memory_space<vmem>>, %arg11: memref<2x16x128xf32, #tpu.memory_space<vmem>>, %arg12: memref<32x128xf32, #tpu.memory_space<vmem>>) attributes {dimension_semantics = [#tpu.dimension_semantics<arbitrary>], iteration_bounds = array<i64: 1>, scalar_prefetch = 0 : i64, scratch_operands = 1 : i64, tpu.core_type = #tpu.core_type<tc>, window_params = [{pipeline_mode = #tpu.pipeline_mode<synchronous>, transform_indices = @transform_0, window_bounds = array<i64: 32, 128>}, {pipeline_mode = #tpu.pipeline_mode<synchronous>, transform_indices = @transform_1, window_bounds = array<i64: 128, 256>}, {pipeline_mode = #tpu.pipeline_mode<synchronous>, transform_indices = @transform_2, window_bounds = array<i64: 4, 128>}, {pipeline_mode = #tpu.pipeline_mode<synchronous>, transform_indices = @transform_3, window_bounds = array<i64: 1, 128>}, {pipeline_mode = #tpu.pipeline_mode<synchronous>, transform_indices = @transform_4, window_bounds = array<i64: 128, 12>}, {pipeline_mode = #tpu.pipeline_mode<synchronous>, transform_indices = @transform_5, window_bounds = array<i64: 8, 128>}, {pipeline_mode = #tpu.pipeline_mode<synchronous>, transform_indices = @transform_6, window_bounds = array<i64: 1, 128>}, {pipeline_mode = #tpu.pipeline_mode<synchronous>, transform_indices = @transform_7, window_bounds = array<i64: 2, 128>}, {pipeline_mode = #tpu.pipeline_mode<synchronous>, transform_indices = @transform_8, window_bounds = array<i64: 1, 128>}, {pipeline_mode = #tpu.pipeline_mode<synchronous>, transform_indices = @transform_9, window_bounds = array<i64: 128, 128>}, {pipeline_mode = #tpu.pipeline_mode<synchronous>, transform_indices = @transform_10, window_bounds = array<i64: 2, 16, 128>}]} {
    %c0 = arith.constant 0 : index
    %c0_0 = arith.constant 0 : index
    %0 = vector.load %arg1[%c0, %c0_0] : memref<32x128xf32, #tpu.memory_space<vmem>>, vector<32x128xf32>
    %1 = arith.truncf %0 : vector<32x128xf32> to vector<32x128xbf16>
    %c0_1 = arith.constant 0 : index
    %c0_2 = arith.constant 0 : index
    %2 = vector.load %arg2[%c0_1, %c0_2] : memref<128x256xbf16, #tpu.memory_space<vmem>>, vector<128x256xbf16>
    %cst = arith.constant dense<0.000000e+00> : vector<32x256xf32>
    %3 = tpu.matmul %1, %2, %cst {dimension_numbers = #tpu.dot_dimension_numbers<[1], [0], [0], [1], [0, 0, 1, 1], [], []>} : vector<32x128xbf16>, vector<128x256xbf16>, vector<32x256xf32> -> vector<32x256xf32>
    %4 = vector.extract_strided_slice %3 {offsets = [0, 0], sizes = [32, 128], strides = [1, 1]} : vector<32x256xf32> to vector<32x128xf32>
    %5 = vector.extract_strided_slice %3 {offsets = [0, 128], sizes = [32, 128], strides = [1, 1]} : vector<32x256xf32> to vector<32x128xf32>
    %cst_3 = arith.constant 0.000000e+00 : f32
    %6 = vector.broadcast %cst_3 : f32 to vector<6x128xf32>
    %7 = tpu.concatenate %6, %4 in 0 : vector<6x128xf32>, vector<32x128xf32> -> vector<38x128xf32>
    %c0_4 = arith.constant 0 : index
    %c0_5 = arith.constant 0 : index
    %8 = vector.load %arg4[%c0_4, %c0_5] : memref<1x128xf32, #tpu.memory_space<vmem>>, vector<1x128xf32>
    %9 = vector.shape_cast %8 : vector<1x128xf32> to vector<128xf32>
    %10 = vector.shape_cast %9 : vector<128xf32> to vector<1x128xf32>
    %11 = vector.shape_cast %10 : vector<1x128xf32> to vector<1x128xf32>
    %12 = vector.broadcast %11 : vector<1x128xf32> to vector<32x128xf32>
    %13 = vector.extract_strided_slice %7 {offsets = [0, 0], sizes = [32, 128], strides = [1, 1]} : vector<38x128xf32> to vector<32x128xf32>
    %c0_6 = arith.constant 0 : index
    %c0_7 = arith.constant 0 : index
    %14 = vector.load %arg3[%c0_6, %c0_7] : memref<4x128xf32, #tpu.memory_space<vmem>>, vector<1x128xf32>
    %15 = vector.shape_cast %14 : vector<1x128xf32> to vector<128xf32>
    %16 = vector.shape_cast %15 : vector<128xf32> to vector<1x128xf32>
    %17 = vector.broadcast %16 : vector<1x128xf32> to vector<32x128xf32>
    %18 = arith.mulf %13, %17 : vector<32x128xf32>
    %19 = arith.addf %12, %18 : vector<32x128xf32>
    %20 = vector.extract_strided_slice %7 {offsets = [2, 0], sizes = [32, 128], strides = [1, 1]} : vector<38x128xf32> to vector<32x128xf32>
    %c1 = arith.constant 1 : index
    %c0_8 = arith.constant 0 : index
    %21 = vector.load %arg3[%c1, %c0_8] : memref<4x128xf32, #tpu.memory_space<vmem>>, vector<1x128xf32>
    %22 = vector.shape_cast %21 : vector<1x128xf32> to vector<128xf32>
    %23 = vector.shape_cast %22 : vector<128xf32> to vector<1x128xf32>
    %24 = vector.broadcast %23 : vector<1x128xf32> to vector<32x128xf32>
    %25 = arith.mulf %20, %24 : vector<32x128xf32>
    %26 = arith.addf %19, %25 : vector<32x128xf32>
    %27 = vector.extract_strided_slice %7 {offsets = [4, 0], sizes = [32, 128], strides = [1, 1]} : vector<38x128xf32> to vector<32x128xf32>
    %c2 = arith.constant 2 : index
    %c0_9 = arith.constant 0 : index
    %28 = vector.load %arg3[%c2, %c0_9] : memref<4x128xf32, #tpu.memory_space<vmem>>, vector<1x128xf32>
    %29 = vector.shape_cast %28 : vector<1x128xf32> to vector<128xf32>
    %30 = vector.shape_cast %29 : vector<128xf32> to vector<1x128xf32>
    %31 = vector.broadcast %30 : vector<1x128xf32> to vector<32x128xf32>
    %32 = arith.mulf %27, %31 : vector<32x128xf32>
    %33 = arith.addf %26, %32 : vector<32x128xf32>
    %c3 = arith.constant 3 : index
    %c0_10 = arith.constant 0 : index
    %34 = vector.load %arg3[%c3, %c0_10] : memref<4x128xf32, #tpu.memory_space<vmem>>, vector<1x128xf32>
    %35 = vector.shape_cast %34 : vector<1x128xf32> to vector<128xf32>
    %36 = vector.shape_cast %35 : vector<128xf32> to vector<1x128xf32>
    %37 = vector.broadcast %36 : vector<1x128xf32> to vector<32x128xf32>
    %38 = arith.mulf %4, %37 : vector<32x128xf32>
    %39 = arith.addf %33, %38 : vector<32x128xf32>
    %40 = arith.negf %39 : vector<32x128xf32>
    %41 = math.exp %40 : vector<32x128xf32>
    %cst_11 = arith.constant 1.000000e+00 : f32
    %42 = vector.broadcast %cst_11 : f32 to vector<32x128xf32>
    %43 = arith.addf %42, %41 : vector<32x128xf32>
    %44 = arith.divf %42, %43 : vector<32x128xf32>
    %45 = arith.mulf %39, %44 : vector<32x128xf32>
    %46 = arith.truncf %45 : vector<32x128xf32> to vector<32x128xbf16>
    %c0_12 = arith.constant 0 : index
    %c0_13 = arith.constant 0 : index
    %47 = vector.load %arg5[%c0_12, %c0_13] : memref<128x12xbf16, #tpu.memory_space<vmem>>, vector<128x12xbf16>
    %cst_14 = arith.constant dense<0.000000e+00> : vector<32x12xf32>
    %48 = tpu.matmul %46, %47, %cst_14 {dimension_numbers = #tpu.dot_dimension_numbers<[1], [0], [0], [1], [0, 0, 1, 1], [], []>} : vector<32x128xbf16>, vector<128x12xbf16>, vector<32x12xf32> -> vector<32x12xf32>
    %49 = vector.extract_strided_slice %48 {offsets = [0, 0], sizes = [32, 8], strides = [1, 1]} : vector<32x12xf32> to vector<32x8xf32>
    %50 = arith.truncf %49 : vector<32x8xf32> to vector<32x8xbf16>
    %c0_15 = arith.constant 0 : index
    %c0_16 = arith.constant 0 : index
    %51 = vector.load %arg6[%c0_15, %c0_16] : memref<8x128xbf16, #tpu.memory_space<vmem>>, vector<8x128xbf16>
    %cst_17 = arith.constant dense<0.000000e+00> : vector<32x128xf32>
    %52 = tpu.matmul %50, %51, %cst_17 {dimension_numbers = #tpu.dot_dimension_numbers<[1], [0], [0], [1], [0, 0, 1, 1], [], []>} : vector<32x8xbf16>, vector<8x128xbf16>, vector<32x128xf32> -> vector<32x128xf32>
    %c0_18 = arith.constant 0 : index
    %c0_19 = arith.constant 0 : index
    %53 = vector.load %arg7[%c0_18, %c0_19] : memref<1x128xf32, #tpu.memory_space<vmem>>, vector<1x128xf32>
    %54 = vector.shape_cast %53 : vector<1x128xf32> to vector<128xf32>
    %55 = vector.shape_cast %54 : vector<128xf32> to vector<1x128xf32>
    %56 = vector.broadcast %55 : vector<1x128xf32> to vector<32x128xf32>
    %57 = arith.addf %52, %56 : vector<32x128xf32>
    %cst_20 = arith.constant 0.000000e+00 : f32
    %58 = vector.broadcast %cst_20 : f32 to vector<32x128xf32>
    %59 = arith.maximumf %57, %58 : vector<32x128xf32>
    %60 = vector.broadcast %cst_20 : f32 to vector<32x128xf32>
    %61 = arith.subf %57, %60 : vector<32x128xf32>
    %62 = arith.cmpf one, %61, %61 : vector<32x128xf32>
    %63 = vector.broadcast %cst_20 : f32 to vector<32x128xf32>
    %64 = arith.addf %57, %63 : vector<32x128xf32>
    %65 = math.absf %61 : vector<32x128xf32>
    %cst_21 = arith.constant 0.000000e+00 : f32
    %66 = vector.broadcast %cst_21 : f32 to vector<32x128xf32>
    %67 = arith.subf %66, %65 : vector<32x128xf32>
    %68 = math.exp %67 : vector<32x128xf32>
    %69 = math.log1p %68 : vector<32x128xf32>
    %70 = arith.addf %59, %69 : vector<32x128xf32>
    %71 = arith.select %62, %64, %70 : vector<32x128xi1>, vector<32x128xf32>
    %c0_22 = arith.constant 0 : index
    %c0_23 = arith.constant 0 : index
    %72 = vector.load %arg8[%c0_22, %c0_23] : memref<2x128xf32, #tpu.memory_space<vmem>>, vector<2x128xf32>
    %73 = vector.extract_strided_slice %72 {offsets = [0, 0], sizes = [1, 128], strides = [1, 1]} : vector<2x128xf32> to vector<1x128xf32>
    %74 = vector.broadcast %73 : vector<1x128xf32> to vector<32x128xf32>
    %75 = arith.mulf %71, %74 : vector<32x128xf32>
    %76 = math.exp %75 : vector<32x128xf32>
    %77 = vector.extract_strided_slice %72 {offsets = [1, 0], sizes = [1, 128], strides = [1, 1]} : vector<2x128xf32> to vector<1x128xf32>
    %78 = vector.broadcast %77 : vector<1x128xf32> to vector<32x128xf32>
    %79 = arith.mulf %71, %78 : vector<32x128xf32>
    %80 = math.exp %79 : vector<32x128xf32>
    %81 = vector.extract_strided_slice %48 {offsets = [0, 8], sizes = [32, 1], strides = [1, 1]} : vector<32x12xf32> to vector<32x1xf32>
    %82 = vector.broadcast %81 : vector<32x1xf32> to vector<32x128xf32>
    %83 = arith.mulf %71, %82 : vector<32x128xf32>
    %84 = vector.extract_strided_slice %48 {offsets = [0, 9], sizes = [32, 1], strides = [1, 1]} : vector<32x12xf32> to vector<32x1xf32>
    %85 = vector.broadcast %84 : vector<32x1xf32> to vector<32x128xf32>
    %86 = arith.mulf %71, %85 : vector<32x128xf32>
    %87 = vector.extract_strided_slice %48 {offsets = [0, 10], sizes = [32, 1], strides = [1, 1]} : vector<32x12xf32> to vector<32x1xf32>
    %88 = vector.shape_cast %87 : vector<32x1xf32> to vector<32x1xf32>
    %89 = vector.broadcast %88 : vector<32x1xf32> to vector<32x128xf32>
    %90 = vector.extract_strided_slice %48 {offsets = [0, 11], sizes = [32, 1], strides = [1, 1]} : vector<32x12xf32> to vector<32x1xf32>
    %91 = vector.shape_cast %90 : vector<32x1xf32> to vector<32x1xf32>
    %92 = vector.broadcast %91 : vector<32x1xf32> to vector<32x128xf32>
    %cst_24 = arith.constant 0.000000e+00 : f32
    %93 = vector.broadcast %cst_24 : f32 to vector<2x128xf32>
    %cst_25 = arith.constant 0.000000e+00 : f32
    %94 = vector.broadcast %cst_25 : f32 to vector<2x128xf32>
    %95 = vector.extract_strided_slice %76 {offsets = [0, 0], sizes = [2, 128], strides = [1, 1]} : vector<32x128xf32> to vector<2x128xf32>
    %96 = arith.mulf %95, %93 : vector<2x128xf32>
    %97 = vector.extract_strided_slice %83 {offsets = [0, 0], sizes = [2, 128], strides = [1, 1]} : vector<32x128xf32> to vector<2x128xf32>
    %98 = arith.addf %96, %97 : vector<2x128xf32>
    %99 = vector.extract_strided_slice %89 {offsets = [0, 0], sizes = [2, 128], strides = [1, 1]} : vector<32x128xf32> to vector<2x128xf32>
    %100 = arith.mulf %98, %99 : vector<2x128xf32>
    %101 = vector.extract_strided_slice %80 {offsets = [0, 0], sizes = [2, 128], strides = [1, 1]} : vector<32x128xf32> to vector<2x128xf32>
    %102 = arith.mulf %101, %94 : vector<2x128xf32>
    %103 = vector.extract_strided_slice %86 {offsets = [0, 0], sizes = [2, 128], strides = [1, 1]} : vector<32x128xf32> to vector<2x128xf32>
    %104 = arith.addf %102, %103 : vector<2x128xf32>
    %105 = vector.extract_strided_slice %92 {offsets = [0, 0], sizes = [2, 128], strides = [1, 1]} : vector<32x128xf32> to vector<2x128xf32>
    %106 = arith.mulf %104, %105 : vector<2x128xf32>
    %107 = arith.addf %100, %106 : vector<2x128xf32>
    %c0_26 = arith.constant 0 : index
    %c0_27 = arith.constant 0 : index
    %108 = vector.load %arg12[%c0_26, %c0_27] : memref<32x128xf32, #tpu.memory_space<vmem>>, vector<2x128xf32>
    tpu.vector_store %arg12[%c0_26, %c0_27], %107 {strides = array<i32>} : memref<32x128xf32, #tpu.memory_space<vmem>>, vector<2x128xf32>,
    %109 = vector.extract_strided_slice %76 {offsets = [2, 0], sizes = [2, 128], strides = [1, 1]} : vector<32x128xf32> to vector<2x128xf32>
    %110 = arith.mulf %109, %98 : vector<2x128xf32>
    %111 = vector.extract_strided_slice %83 {offsets = [2, 0], sizes = [2, 128], strides = [1, 1]} : vector<32x128xf32> to vector<2x128xf32>
    %112 = arith.addf %110, %111 : vector<2x128xf32>
    %113 = vector.extract_strided_slice %89 {offsets = [2, 0], sizes = [2, 128], strides = [1, 1]} : vector<32x128xf32> to vector<2x128xf32>
    %114 = arith.mulf %112, %113 : vector<2x128xf32>
    %115 = vector.extract_strided_slice %80 {offsets = [2, 0], sizes = [2, 128], strides = [1, 1]} : vector<32x128xf32> to vector<2x128xf32>
    %116 = arith.mulf %115, %104 : vector<2x128xf32>
    %117 = vector.extract_strided_slice %86 {offsets = [2, 0], sizes = [2, 128], strides = [1, 1]} : vector<32x128xf32> to vector<2x128xf32>
    %118 = arith.addf %116, %117 : vector<2x128xf32>
    %119 = vector.extract_strided_slice %92 {offsets = [2, 0], sizes = [2, 128], strides = [1, 1]} : vector<32x128xf32> to vector<2x128xf32>
    %120 = arith.mulf %118, %119 : vector<2x128xf32>
    %121 = arith.addf %114, %120 : vector<2x128xf32>
    %c2_28 = arith.constant 2 : index
    %c0_29 = arith.constant 0 : index
    %122 = vector.load %arg12[%c2_28, %c0_29] : memref<32x128xf32, #tpu.memory_space<vmem>>, vector<2x128xf32>
    tpu.vector_store %arg12[%c2_28, %c0_29], %121 {strides = array<i32>} : memref<32x128xf32, #tpu.memory_space<vmem>>, vector<2x128xf32>,
    %123 = vector.extract_strided_slice %76 {offsets = [4, 0], sizes = [2, 128], strides = [1, 1]} : vector<32x128xf32> to vector<2x128xf32>
    %124 = arith.mulf %123, %112 : vector<2x128xf32>
    %125 = vector.extract_strided_slice %83 {offsets = [4, 0], sizes = [2, 128], strides = [1, 1]} : vector<32x128xf32> to vector<2x128xf32>
    %126 = arith.addf %124, %125 : vector<2x128xf32>
    %127 = vector.extract_strided_slice %89 {offsets = [4, 0], sizes = [2, 128], strides = [1, 1]} : vector<32x128xf32> to vector<2x128xf32>
    %128 = arith.mulf %126, %127 : vector<2x128xf32>
    %129 = vector.extract_strided_slice %80 {offsets = [4, 0], sizes = [2, 128], strides = [1, 1]} : vector<32x128xf32> to vector<2x128xf32>
    %130 = arith.mulf %129, %118 : vector<2x128xf32>
    %131 = vector.extract_strided_slice %86 {offsets = [4, 0], sizes = [2, 128], strides = [1, 1]} : vector<32x128xf32> to vector<2x128xf32>
    %132 = arith.addf %130, %131 : vector<2x128xf32>
    %133 = vector.extract_strided_slice %92 {offsets = [4, 0], sizes = [2, 128], strides = [1, 1]} : vector<32x128xf32> to vector<2x128xf32>
    %134 = arith.mulf %132, %133 : vector<2x128xf32>
    %135 = arith.addf %128, %134 : vector<2x128xf32>
    %c4 = arith.constant 4 : index
    %c0_30 = arith.constant 0 : index
    %136 = vector.load %arg12[%c4, %c0_30] : memref<32x128xf32, #tpu.memory_space<vmem>>, vector<2x128xf32>
    tpu.vector_store %arg12[%c4, %c0_30], %135 {strides = array<i32>} : memref<32x128xf32, #tpu.memory_space<vmem>>, vector<2x128xf32>,
    %137 = vector.extract_strided_slice %76 {offsets = [6, 0], sizes = [2, 128], strides = [1, 1]} : vector<32x128xf32> to vector<2x128xf32>
    %138 = arith.mulf %137, %126 : vector<2x128xf32>
    %139 = vector.extract_strided_slice %83 {offsets = [6, 0], sizes = [2, 128], strides = [1, 1]} : vector<32x128xf32> to vector<2x128xf32>
    %140 = arith.addf %138, %139 : vector<2x128xf32>
    %141 = vector.extract_strided_slice %89 {offsets = [6, 0], sizes = [2, 128], strides = [1, 1]} : vector<32x128xf32> to vector<2x128xf32>
    %142 = arith.mulf %140, %141 : vector<2x128xf32>
    %143 = vector.extract_strided_slice %80 {offsets = [6, 0], sizes = [2, 128], strides = [1, 1]} : vector<32x128xf32> to vector<2x128xf32>
    %144 = arith.mulf %143, %132 : vector<2x128xf32>
    %145 = vector.extract_strided_slice %86 {offsets = [6, 0], sizes = [2, 128], strides = [1, 1]} : vector<32x128xf32> to vector<2x128xf32>
    %146 = arith.addf %144, %145 : vector<2x128xf32>
    %147 = vector.extract_strided_slice %92 {offsets = [6, 0], sizes = [2, 128], strides = [1, 1]} : vector<32x128xf32> to vector<2x128xf32>
    %148 = arith.mulf %146, %147 : vector<2x128xf32>
    %149 = arith.addf %142, %148 : vector<2x128xf32>
    %c6 = arith.constant 6 : index
    %c0_31 = arith.constant 0 : index
    %150 = vector.load %arg12[%c6, %c0_31] : memref<32x128xf32, #tpu.memory_space<vmem>>, vector<2x128xf32>
    tpu.vector_store %arg12[%c6, %c0_31], %149 {strides = array<i32>} : memref<32x128xf32, #tpu.memory_space<vmem>>, vector<2x128xf32>,
    %151 = vector.extract_strided_slice %76 {offsets = [8, 0], sizes = [2, 128], strides = [1, 1]} : vector<32x128xf32> to vector<2x128xf32>
    %152 = arith.mulf %151, %140 : vector<2x128xf32>
    %153 = vector.extract_strided_slice %83 {offsets = [8, 0], sizes = [2, 128], strides = [1, 1]} : vector<32x128xf32> to vector<2x128xf32>
    %154 = arith.addf %152, %153 : vector<2x128xf32>
    %155 = vector.extract_strided_slice %89 {offsets = [8, 0], sizes = [2, 128], strides = [1, 1]} : vector<32x128xf32> to vector<2x128xf32>
    %156 = arith.mulf %154, %155 : vector<2x128xf32>
    %157 = vector.extract_strided_slice %80 {offsets = [8, 0], sizes = [2, 128], strides = [1, 1]} : vector<32x128xf32> to vector<2x128xf32>
    %158 = arith.mulf %157, %146 : vector<2x128xf32>
    %159 = vector.extract_strided_slice %86 {offsets = [8, 0], sizes = [2, 128], strides = [1, 1]} : vector<32x128xf32> to vector<2x128xf32>
    %160 = arith.addf %158, %159 : vector<2x128xf32>
    %161 = vector.extract_strided_slice %92 {offsets = [8, 0], sizes = [2, 128], strides = [1, 1]} : vector<32x128xf32> to vector<2x128xf32>
    %162 = arith.mulf %160, %161 : vector<2x128xf32>
    %163 = arith.addf %156, %162 : vector<2x128xf32>
    %c8 = arith.constant 8 : index
    %c0_32 = arith.constant 0 : index
    %164 = vector.load %arg12[%c8, %c0_32] : memref<32x128xf32, #tpu.memory_space<vmem>>, vector<2x128xf32>
    tpu.vector_store %arg12[%c8, %c0_32], %163 {strides = array<i32>} : memref<32x128xf32, #tpu.memory_space<vmem>>, vector<2x128xf32>,
    %165 = vector.extract_strided_slice %76 {offsets = [10, 0], sizes = [2, 128], strides = [1, 1]} : vector<32x128xf32> to vector<2x128xf32>
    %166 = arith.mulf %165, %154 : vector<2x128xf32>
    %167 = vector.extract_strided_slice %83 {offsets = [10, 0], sizes = [2, 128], strides = [1, 1]} : vector<32x128xf32> to vector<2x128xf32>
    %168 = arith.addf %166, %167 : vector<2x128xf32>
    %169 = vector.extract_strided_slice %89 {offsets = [10, 0], sizes = [2, 128], strides = [1, 1]} : vector<32x128xf32> to vector<2x128xf32>
    %170 = arith.mulf %168, %169 : vector<2x128xf32>
    %171 = vector.extract_strided_slice %80 {offsets = [10, 0], sizes = [2, 128], strides = [1, 1]} : vector<32x128xf32> to vector<2x128xf32>
    %172 = arith.mulf %171, %160 : vector<2x128xf32>
    %173 = vector.extract_strided_slice %86 {offsets = [10, 0], sizes = [2, 128], strides = [1, 1]} : vector<32x128xf32> to vector<2x128xf32>
    %174 = arith.addf %172, %173 : vector<2x128xf32>
    %175 = vector.extract_strided_slice %92 {offsets = [10, 0], sizes = [2, 128], strides = [1, 1]} : vector<32x128xf32> to vector<2x128xf32>
    %176 = arith.mulf %174, %175 : vector<2x128xf32>
    %177 = arith.addf %170, %176 : vector<2x128xf32>
    %c10 = arith.constant 10 : index
    %c0_33 = arith.constant 0 : index
    %178 = vector.load %arg12[%c10, %c0_33] : memref<32x128xf32, #tpu.memory_space<vmem>>, vector<2x128xf32>
    tpu.vector_store %arg12[%c10, %c0_33], %177 {strides = array<i32>} : memref<32x128xf32, #tpu.memory_space<vmem>>, vector<2x128xf32>,
    %179 = vector.extract_strided_slice %76 {offsets = [12, 0], sizes = [2, 128], strides = [1, 1]} : vector<32x128xf32> to vector<2x128xf32>
    %180 = arith.mulf %179, %168 : vector<2x128xf32>
    %181 = vector.extract_strided_slice %83 {offsets = [12, 0], sizes = [2, 128], strides = [1, 1]} : vector<32x128xf32> to vector<2x128xf32>
    %182 = arith.addf %180, %181 : vector<2x128xf32>
    %183 = vector.extract_strided_slice %89 {offsets = [12, 0], sizes = [2, 128], strides = [1, 1]} : vector<32x128xf32> to vector<2x128xf32>
    %184 = arith.mulf %182, %183 : vector<2x128xf32>
    %185 = vector.extract_strided_slice %80 {offsets = [12, 0], sizes = [2, 128], strides = [1, 1]} : vector<32x128xf32> to vector<2x128xf32>
    %186 = arith.mulf %185, %174 : vector<2x128xf32>
    %187 = vector.extract_strided_slice %86 {offsets = [12, 0], sizes = [2, 128], strides = [1, 1]} : vector<32x128xf32> to vector<2x128xf32>
    %188 = arith.addf %186, %187 : vector<2x128xf32>
    %189 = vector.extract_strided_slice %92 {offsets = [12, 0], sizes = [2, 128], strides = [1, 1]} : vector<32x128xf32> to vector<2x128xf32>
    %190 = arith.mulf %188, %189 : vector<2x128xf32>
    %191 = arith.addf %184, %190 : vector<2x128xf32>
    %c12 = arith.constant 12 : index
    %c0_34 = arith.constant 0 : index
    %192 = vector.load %arg12[%c12, %c0_34] : memref<32x128xf32, #tpu.memory_space<vmem>>, vector<2x128xf32>
    tpu.vector_store %arg12[%c12, %c0_34], %191 {strides = array<i32>} : memref<32x128xf32, #tpu.memory_space<vmem>>, vector<2x128xf32>,
    %193 = vector.extract_strided_slice %76 {offsets = [14, 0], sizes = [2, 128], strides = [1, 1]} : vector<32x128xf32> to vector<2x128xf32>
    %194 = arith.mulf %193, %182 : vector<2x128xf32>
    %195 = vector.extract_strided_slice %83 {offsets = [14, 0], sizes = [2, 128], strides = [1, 1]} : vector<32x128xf32> to vector<2x128xf32>
    %196 = arith.addf %194, %195 : vector<2x128xf32>
    %197 = vector.extract_strided_slice %89 {offsets = [14, 0], sizes = [2, 128], strides = [1, 1]} : vector<32x128xf32> to vector<2x128xf32>
    %198 = arith.mulf %196, %197 : vector<2x128xf32>
    %199 = vector.extract_strided_slice %80 {offsets = [14, 0], sizes = [2, 128], strides = [1, 1]} : vector<32x128xf32> to vector<2x128xf32>
    %200 = arith.mulf %199, %188 : vector<2x128xf32>
    %201 = vector.extract_strided_slice %86 {offsets = [14, 0], sizes = [2, 128], strides = [1, 1]} : vector<32x128xf32> to vector<2x128xf32>
    %202 = arith.addf %200, %201 : vector<2x128xf32>
    %203 = vector.extract_strided_slice %92 {offsets = [14, 0], sizes = [2, 128], strides = [1, 1]} : vector<32x128xf32> to vector<2x128xf32>
    %204 = arith.mulf %202, %203 : vector<2x128xf32>
    %205 = arith.addf %198, %204 : vector<2x128xf32>
    %c14 = arith.constant 14 : index
    %c0_35 = arith.constant 0 : index
    %206 = vector.load %arg12[%c14, %c0_35] : memref<32x128xf32, #tpu.memory_space<vmem>>, vector<2x128xf32>
    tpu.vector_store %arg12[%c14, %c0_35], %205 {strides = array<i32>} : memref<32x128xf32, #tpu.memory_space<vmem>>, vector<2x128xf32>,
    %207 = vector.extract_strided_slice %76 {offsets = [16, 0], sizes = [2, 128], strides = [1, 1]} : vector<32x128xf32> to vector<2x128xf32>
    %208 = arith.mulf %207, %196 : vector<2x128xf32>
    %209 = vector.extract_strided_slice %83 {offsets = [16, 0], sizes = [2, 128], strides = [1, 1]} : vector<32x128xf32> to vector<2x128xf32>
    %210 = arith.addf %208, %209 : vector<2x128xf32>
    %211 = vector.extract_strided_slice %89 {offsets = [16, 0], sizes = [2, 128], strides = [1, 1]} : vector<32x128xf32> to vector<2x128xf32>
    %212 = arith.mulf %210, %211 : vector<2x128xf32>
    %213 = vector.extract_strided_slice %80 {offsets = [16, 0], sizes = [2, 128], strides = [1, 1]} : vector<32x128xf32> to vector<2x128xf32>
    %214 = arith.mulf %213, %202 : vector<2x128xf32>
    %215 = vector.extract_strided_slice %86 {offsets = [16, 0], sizes = [2, 128], strides = [1, 1]} : vector<32x128xf32> to vector<2x128xf32>
    %216 = arith.addf %214, %215 : vector<2x128xf32>
    %217 = vector.extract_strided_slice %92 {offsets = [16, 0], sizes = [2, 128], strides = [1, 1]} : vector<32x128xf32> to vector<2x128xf32>
    %218 = arith.mulf %216, %217 : vector<2x128xf32>
    %219 = arith.addf %212, %218 : vector<2x128xf32>
    %c16 = arith.constant 16 : index
    %c0_36 = arith.constant 0 : index
    %220 = vector.load %arg12[%c16, %c0_36] : memref<32x128xf32, #tpu.memory_space<vmem>>, vector<2x128xf32>
    tpu.vector_store %arg12[%c16, %c0_36], %219 {strides = array<i32>} : memref<32x128xf32, #tpu.memory_space<vmem>>, vector<2x128xf32>,
    %221 = vector.extract_strided_slice %76 {offsets = [18, 0], sizes = [2, 128], strides = [1, 1]} : vector<32x128xf32> to vector<2x128xf32>
    %222 = arith.mulf %221, %210 : vector<2x128xf32>
    %223 = vector.extract_strided_slice %83 {offsets = [18, 0], sizes = [2, 128], strides = [1, 1]} : vector<32x128xf32> to vector<2x128xf32>
    %224 = arith.addf %222, %223 : vector<2x128xf32>
    %225 = vector.extract_strided_slice %89 {offsets = [18, 0], sizes = [2, 128], strides = [1, 1]} : vector<32x128xf32> to vector<2x128xf32>
    %226 = arith.mulf %224, %225 : vector<2x128xf32>
    %227 = vector.extract_strided_slice %80 {offsets = [18, 0], sizes = [2, 128], strides = [1, 1]} : vector<32x128xf32> to vector<2x128xf32>
    %228 = arith.mulf %227, %216 : vector<2x128xf32>
    %229 = vector.extract_strided_slice %86 {offsets = [18, 0], sizes = [2, 128], strides = [1, 1]} : vector<32x128xf32> to vector<2x128xf32>
    %230 = arith.addf %228, %229 : vector<2x128xf32>
    %231 = vector.extract_strided_slice %92 {offsets = [18, 0], sizes = [2, 128], strides = [1, 1]} : vector<32x128xf32> to vector<2x128xf32>
    %232 = arith.mulf %230, %231 : vector<2x128xf32>
    %233 = arith.addf %226, %232 : vector<2x128xf32>
    %c18 = arith.constant 18 : index
    %c0_37 = arith.constant 0 : index
    %234 = vector.load %arg12[%c18, %c0_37] : memref<32x128xf32, #tpu.memory_space<vmem>>, vector<2x128xf32>
    tpu.vector_store %arg12[%c18, %c0_37], %233 {strides = array<i32>} : memref<32x128xf32, #tpu.memory_space<vmem>>, vector<2x128xf32>,
    %235 = vector.extract_strided_slice %76 {offsets = [20, 0], sizes = [2, 128], strides = [1, 1]} : vector<32x128xf32> to vector<2x128xf32>
    %236 = arith.mulf %235, %224 : vector<2x128xf32>
    %237 = vector.extract_strided_slice %83 {offsets = [20, 0], sizes = [2, 128], strides = [1, 1]} : vector<32x128xf32> to vector<2x128xf32>
    %238 = arith.addf %236, %237 : vector<2x128xf32>
    %239 = vector.extract_strided_slice %89 {offsets = [20, 0], sizes = [2, 128], strides = [1, 1]} : vector<32x128xf32> to vector<2x128xf32>
    %240 = arith.mulf %238, %239 : vector<2x128xf32>
    %241 = vector.extract_strided_slice %80 {offsets = [20, 0], sizes = [2, 128], strides = [1, 1]} : vector<32x128xf32> to vector<2x128xf32>
    %242 = arith.mulf %241, %230 : vector<2x128xf32>
    %243 = vector.extract_strided_slice %86 {offsets = [20, 0], sizes = [2, 128], strides = [1, 1]} : vector<32x128xf32> to vector<2x128xf32>
    %244 = arith.addf %242, %243 : vector<2x128xf32>
    %245 = vector.extract_strided_slice %92 {offsets = [20, 0], sizes = [2, 128], strides = [1, 1]} : vector<32x128xf32> to vector<2x128xf32>
    %246 = arith.mulf %244, %245 : vector<2x128xf32>
    %247 = arith.addf %240, %246 : vector<2x128xf32>
    %c20 = arith.constant 20 : index
    %c0_38 = arith.constant 0 : index
    %248 = vector.load %arg12[%c20, %c0_38] : memref<32x128xf32, #tpu.memory_space<vmem>>, vector<2x128xf32>
    tpu.vector_store %arg12[%c20, %c0_38], %247 {strides = array<i32>} : memref<32x128xf32, #tpu.memory_space<vmem>>, vector<2x128xf32>,
    %249 = vector.extract_strided_slice %76 {offsets = [22, 0], sizes = [2, 128], strides = [1, 1]} : vector<32x128xf32> to vector<2x128xf32>
    %250 = arith.mulf %249, %238 : vector<2x128xf32>
    %251 = vector.extract_strided_slice %83 {offsets = [22, 0], sizes = [2, 128], strides = [1, 1]} : vector<32x128xf32> to vector<2x128xf32>
    %252 = arith.addf %250, %251 : vector<2x128xf32>
    %253 = vector.extract_strided_slice %89 {offsets = [22, 0], sizes = [2, 128], strides = [1, 1]} : vector<32x128xf32> to vector<2x128xf32>
    %254 = arith.mulf %252, %253 : vector<2x128xf32>
    %255 = vector.extract_strided_slice %80 {offsets = [22, 0], sizes = [2, 128], strides = [1, 1]} : vector<32x128xf32> to vector<2x128xf32>
    %256 = arith.mulf %255, %244 : vector<2x128xf32>
    %257 = vector.extract_strided_slice %86 {offsets = [22, 0], sizes = [2, 128], strides = [1, 1]} : vector<32x128xf32> to vector<2x128xf32>
    %258 = arith.addf %256, %257 : vector<2x128xf32>
    %259 = vector.extract_strided_slice %92 {offsets = [22, 0], sizes = [2, 128], strides = [1, 1]} : vector<32x128xf32> to vector<2x128xf32>
    %260 = arith.mulf %258, %259 : vector<2x128xf32>
    %261 = arith.addf %254, %260 : vector<2x128xf32>
    %c22 = arith.constant 22 : index
    %c0_39 = arith.constant 0 : index
    %262 = vector.load %arg12[%c22, %c0_39] : memref<32x128xf32, #tpu.memory_space<vmem>>, vector<2x128xf32>
    tpu.vector_store %arg12[%c22, %c0_39], %261 {strides = array<i32>} : memref<32x128xf32, #tpu.memory_space<vmem>>, vector<2x128xf32>,
    %263 = vector.extract_strided_slice %76 {offsets = [24, 0], sizes = [2, 128], strides = [1, 1]} : vector<32x128xf32> to vector<2x128xf32>
    %264 = arith.mulf %263, %252 : vector<2x128xf32>
    %265 = vector.extract_strided_slice %83 {offsets = [24, 0], sizes = [2, 128], strides = [1, 1]} : vector<32x128xf32> to vector<2x128xf32>
    %266 = arith.addf %264, %265 : vector<2x128xf32>
    %267 = vector.extract_strided_slice %89 {offsets = [24, 0], sizes = [2, 128], strides = [1, 1]} : vector<32x128xf32> to vector<2x128xf32>
    %268 = arith.mulf %266, %267 : vector<2x128xf32>
    %269 = vector.extract_strided_slice %80 {offsets = [24, 0], sizes = [2, 128], strides = [1, 1]} : vector<32x128xf32> to vector<2x128xf32>
    %270 = arith.mulf %269, %258 : vector<2x128xf32>
    %271 = vector.extract_strided_slice %86 {offsets = [24, 0], sizes = [2, 128], strides = [1, 1]} : vector<32x128xf32> to vector<2x128xf32>
    %272 = arith.addf %270, %271 : vector<2x128xf32>
    %273 = vector.extract_strided_slice %92 {offsets = [24, 0], sizes = [2, 128], strides = [1, 1]} : vector<32x128xf32> to vector<2x128xf32>
    %274 = arith.mulf %272, %273 : vector<2x128xf32>
    %275 = arith.addf %268, %274 : vector<2x128xf32>
    %c24 = arith.constant 24 : index
    %c0_40 = arith.constant 0 : index
    %276 = vector.load %arg12[%c24, %c0_40] : memref<32x128xf32, #tpu.memory_space<vmem>>, vector<2x128xf32>
    tpu.vector_store %arg12[%c24, %c0_40], %275 {strides = array<i32>} : memref<32x128xf32, #tpu.memory_space<vmem>>, vector<2x128xf32>,
    %277 = vector.extract_strided_slice %76 {offsets = [26, 0], sizes = [2, 128], strides = [1, 1]} : vector<32x128xf32> to vector<2x128xf32>
    %278 = arith.mulf %277, %266 : vector<2x128xf32>
    %279 = vector.extract_strided_slice %83 {offsets = [26, 0], sizes = [2, 128], strides = [1, 1]} : vector<32x128xf32> to vector<2x128xf32>
    %280 = arith.addf %278, %279 : vector<2x128xf32>
    %281 = vector.extract_strided_slice %89 {offsets = [26, 0], sizes = [2, 128], strides = [1, 1]} : vector<32x128xf32> to vector<2x128xf32>
    %282 = arith.mulf %280, %281 : vector<2x128xf32>
    %283 = vector.extract_strided_slice %80 {offsets = [26, 0], sizes = [2, 128], strides = [1, 1]} : vector<32x128xf32> to vector<2x128xf32>
    %284 = arith.mulf %283, %272 : vector<2x128xf32>
    %285 = vector.extract_strided_slice %86 {offsets = [26, 0], sizes = [2, 128], strides = [1, 1]} : vector<32x128xf32> to vector<2x128xf32>
    %286 = arith.addf %284, %285 : vector<2x128xf32>
    %287 = vector.extract_strided_slice %92 {offsets = [26, 0], sizes = [2, 128], strides = [1, 1]} : vector<32x128xf32> to vector<2x128xf32>
    %288 = arith.mulf %286, %287 : vector<2x128xf32>
    %289 = arith.addf %282, %288 : vector<2x128xf32>
    %c26 = arith.constant 26 : index
    %c0_41 = arith.constant 0 : index
    %290 = vector.load %arg12[%c26, %c0_41] : memref<32x128xf32, #tpu.memory_space<vmem>>, vector<2x128xf32>
    tpu.vector_store %arg12[%c26, %c0_41], %289 {strides = array<i32>} : memref<32x128xf32, #tpu.memory_space<vmem>>, vector<2x128xf32>,
    %291 = vector.extract_strided_slice %76 {offsets = [28, 0], sizes = [2, 128], strides = [1, 1]} : vector<32x128xf32> to vector<2x128xf32>
    %292 = arith.mulf %291, %280 : vector<2x128xf32>
    %293 = vector.extract_strided_slice %83 {offsets = [28, 0], sizes = [2, 128], strides = [1, 1]} : vector<32x128xf32> to vector<2x128xf32>
    %294 = arith.addf %292, %293 : vector<2x128xf32>
    %295 = vector.extract_strided_slice %89 {offsets = [28, 0], sizes = [2, 128], strides = [1, 1]} : vector<32x128xf32> to vector<2x128xf32>
    %296 = arith.mulf %294, %295 : vector<2x128xf32>
    %297 = vector.extract_strided_slice %80 {offsets = [28, 0], sizes = [2, 128], strides = [1, 1]} : vector<32x128xf32> to vector<2x128xf32>
    %298 = arith.mulf %297, %286 : vector<2x128xf32>
    %299 = vector.extract_strided_slice %86 {offsets = [28, 0], sizes = [2, 128], strides = [1, 1]} : vector<32x128xf32> to vector<2x128xf32>
    %300 = arith.addf %298, %299 : vector<2x128xf32>
    %301 = vector.extract_strided_slice %92 {offsets = [28, 0], sizes = [2, 128], strides = [1, 1]} : vector<32x128xf32> to vector<2x128xf32>
    %302 = arith.mulf %300, %301 : vector<2x128xf32>
    %303 = arith.addf %296, %302 : vector<2x128xf32>
    %c28 = arith.constant 28 : index
    %c0_42 = arith.constant 0 : index
    %304 = vector.load %arg12[%c28, %c0_42] : memref<32x128xf32, #tpu.memory_space<vmem>>, vector<2x128xf32>
    tpu.vector_store %arg12[%c28, %c0_42], %303 {strides = array<i32>} : memref<32x128xf32, #tpu.memory_space<vmem>>, vector<2x128xf32>,
    %305 = vector.extract_strided_slice %76 {offsets = [30, 0], sizes = [2, 128], strides = [1, 1]} : vector<32x128xf32> to vector<2x128xf32>
    %306 = arith.mulf %305, %294 : vector<2x128xf32>
    %307 = vector.extract_strided_slice %83 {offsets = [30, 0], sizes = [2, 128], strides = [1, 1]} : vector<32x128xf32> to vector<2x128xf32>
    %308 = arith.addf %306, %307 : vector<2x128xf32>
    %309 = vector.extract_strided_slice %89 {offsets = [30, 0], sizes = [2, 128], strides = [1, 1]} : vector<32x128xf32> to vector<2x128xf32>
    %310 = arith.mulf %308, %309 : vector<2x128xf32>
    %311 = vector.extract_strided_slice %80 {offsets = [30, 0], sizes = [2, 128], strides = [1, 1]} : vector<32x128xf32> to vector<2x128xf32>
    %312 = arith.mulf %311, %300 : vector<2x128xf32>
    %313 = vector.extract_strided_slice %86 {offsets = [30, 0], sizes = [2, 128], strides = [1, 1]} : vector<32x128xf32> to vector<2x128xf32>
    %314 = arith.addf %312, %313 : vector<2x128xf32>
    %315 = vector.extract_strided_slice %92 {offsets = [30, 0], sizes = [2, 128], strides = [1, 1]} : vector<32x128xf32> to vector<2x128xf32>
    %316 = arith.mulf %314, %315 : vector<2x128xf32>
    %317 = arith.addf %310, %316 : vector<2x128xf32>
    %c30 = arith.constant 30 : index
    %c0_43 = arith.constant 0 : index
    %318 = vector.load %arg12[%c30, %c0_43] : memref<32x128xf32, #tpu.memory_space<vmem>>, vector<2x128xf32>
    tpu.vector_store %arg12[%c30, %c0_43], %317 {strides = array<i32>} : memref<32x128xf32, #tpu.memory_space<vmem>>, vector<2x128xf32>,
    %c0_44 = arith.constant 0 : index
    %c0_45 = arith.constant 0 : index
    %319 = vector.load %arg12[%c0_44, %c0_45] : memref<32x128xf32, #tpu.memory_space<vmem>>, vector<32x128xf32>
    %c0_46 = arith.constant 0 : index
    %c0_47 = arith.constant 0 : index
    %320 = vector.load %arg9[%c0_46, %c0_47] : memref<1x128xf32, #tpu.memory_space<vmem>>, vector<1x128xf32>
    %321 = vector.shape_cast %320 : vector<1x128xf32> to vector<128xf32>
    %322 = vector.shape_cast %321 : vector<128xf32> to vector<1x128xf32>
    %323 = vector.broadcast %322 : vector<1x128xf32> to vector<32x128xf32>
    %324 = arith.mulf %45, %323 : vector<32x128xf32>
    %325 = arith.addf %319, %324 : vector<32x128xf32>
    %326 = arith.negf %5 : vector<32x128xf32>
    %327 = math.exp %326 : vector<32x128xf32>
    %cst_48 = arith.constant 1.000000e+00 : f32
    %328 = vector.broadcast %cst_48 : f32 to vector<32x128xf32>
    %329 = arith.addf %328, %327 : vector<32x128xf32>
    %330 = arith.divf %328, %329 : vector<32x128xf32>
    %331 = arith.mulf %5, %330 : vector<32x128xf32>
    %332 = arith.mulf %325, %331 : vector<32x128xf32>
    %333 = arith.truncf %332 : vector<32x128xf32> to vector<32x128xbf16>
    %c0_49 = arith.constant 0 : index
    %c0_50 = arith.constant 0 : index
    %334 = vector.load %arg10[%c0_49, %c0_50] : memref<128x128xbf16, #tpu.memory_space<vmem>>, vector<128x128xbf16>
    %cst_51 = arith.constant dense<0.000000e+00> : vector<32x128xf32>
    %335 = tpu.matmul %333, %334, %cst_51 {dimension_numbers = #tpu.dot_dimension_numbers<[1], [0], [0], [1], [0, 0, 1, 1], [], []>} : vector<32x128xbf16>, vector<128x128xbf16>, vector<32x128xf32> -> vector<32x128xf32>
    %336 = vector.extract_strided_slice %335 {offsets = [0, 0], sizes = [1, 128], strides = [1, 1]} : vector<32x128xf32> to vector<1x128xf32>
    %c0_52 = arith.constant 0 : index
    %c0_53 = arith.constant 0 : index
    %c0_54 = arith.constant 0 : index
    %337 = vector.load %arg11[%c0_52, %c0_53, %c0_54] : memref<2x16x128xf32, #tpu.memory_space<vmem>>, vector<1x1x128xf32>
    %338 = vector.shape_cast %337 : vector<1x1x128xf32> to vector<1x128xf32>
    %339 = vector.shape_cast %336 : vector<1x128xf32> to vector<1x1x128xf32>
    tpu.vector_store %arg11[%c0_52, %c0_53, %c0_54], %339 {strides = array<i32>} : memref<2x16x128xf32, #tpu.memory_space<vmem>>, vector<1x1x128xf32>,
    %340 = vector.extract_strided_slice %335 {offsets = [1, 0], sizes = [1, 128], strides = [1, 1]} : vector<32x128xf32> to vector<1x128xf32>
    %c1_55 = arith.constant 1 : index
    %c0_56 = arith.constant 0 : index
    %c0_57 = arith.constant 0 : index
    %341 = vector.load %arg11[%c1_55, %c0_56, %c0_57] : memref<2x16x128xf32, #tpu.memory_space<vmem>>, vector<1x1x128xf32>
    %342 = vector.shape_cast %341 : vector<1x1x128xf32> to vector<1x128xf32>
    %343 = vector.shape_cast %340 : vector<1x128xf32> to vector<1x1x128xf32>
    tpu.vector_store %arg11[%c1_55, %c0_56, %c0_57], %343 {strides = array<i32>} : memref<2x16x128xf32, #tpu.memory_space<vmem>>, vector<1x1x128xf32>,
    %344 = vector.extract_strided_slice %335 {offsets = [2, 0], sizes = [1, 128], strides = [1, 1]} : vector<32x128xf32> to vector<1x128xf32>
    %c0_58 = arith.constant 0 : index
    %c1_59 = arith.constant 1 : index
    %c0_60 = arith.constant 0 : index
    %345 = vector.load %arg11[%c0_58, %c1_59, %c0_60] : memref<2x16x128xf32, #tpu.memory_space<vmem>>, vector<1x1x128xf32>
    %346 = vector.shape_cast %345 : vector<1x1x128xf32> to vector<1x128xf32>
    %347 = vector.shape_cast %344 : vector<1x128xf32> to vector<1x1x128xf32>
    tpu.vector_store %arg11[%c0_58, %c1_59, %c0_60], %347 {strides = array<i32>} : memref<2x16x128xf32, #tpu.memory_space<vmem>>, vector<1x1x128xf32>,
    %348 = vector.extract_strided_slice %335 {offsets = [3, 0], sizes = [1, 128], strides = [1, 1]} : vector<32x128xf32> to vector<1x128xf32>
    %c1_61 = arith.constant 1 : index
    %c1_62 = arith.constant 1 : index
    %c0_63 = arith.constant 0 : index
    %349 = vector.load %arg11[%c1_61, %c1_62, %c0_63] : memref<2x16x128xf32, #tpu.memory_space<vmem>>, vector<1x1x128xf32>
    %350 = vector.shape_cast %349 : vector<1x1x128xf32> to vector<1x128xf32>
    %351 = vector.shape_cast %348 : vector<1x128xf32> to vector<1x1x128xf32>
    tpu.vector_store %arg11[%c1_61, %c1_62, %c0_63], %351 {strides = array<i32>} : memref<2x16x128xf32, #tpu.memory_space<vmem>>, vector<1x1x128xf32>,
    %352 = vector.extract_strided_slice %335 {offsets = [4, 0], sizes = [1, 128], strides = [1, 1]} : vector<32x128xf32> to vector<1x128xf32>
    %c0_64 = arith.constant 0 : index
    %c2_65 = arith.constant 2 : index
    %c0_66 = arith.constant 0 : index
    %353 = vector.load %arg11[%c0_64, %c2_65, %c0_66] : memref<2x16x128xf32, #tpu.memory_space<vmem>>, vector<1x1x128xf32>
    %354 = vector.shape_cast %353 : vector<1x1x128xf32> to vector<1x128xf32>
    %355 = vector.shape_cast %352 : vector<1x128xf32> to vector<1x1x128xf32>
    tpu.vector_store %arg11[%c0_64, %c2_65, %c0_66], %355 {strides = array<i32>} : memref<2x16x128xf32, #tpu.memory_space<vmem>>, vector<1x1x128xf32>,
    %356 = vector.extract_strided_slice %335 {offsets = [5, 0], sizes = [1, 128], strides = [1, 1]} : vector<32x128xf32> to vector<1x128xf32>
    %c1_67 = arith.constant 1 : index
    %c2_68 = arith.constant 2 : index
    %c0_69 = arith.constant 0 : index
    %357 = vector.load %arg11[%c1_67, %c2_68, %c0_69] : memref<2x16x128xf32, #tpu.memory_space<vmem>>, vector<1x1x128xf32>
    %358 = vector.shape_cast %357 : vector<1x1x128xf32> to vector<1x128xf32>
    %359 = vector.shape_cast %356 : vector<1x128xf32> to vector<1x1x128xf32>
    tpu.vector_store %arg11[%c1_67, %c2_68, %c0_69], %359 {strides = array<i32>} : memref<2x16x128xf32, #tpu.memory_space<vmem>>, vector<1x1x128xf32>,
    %360 = vector.extract_strided_slice %335 {offsets = [6, 0], sizes = [1, 128], strides = [1, 1]} : vector<32x128xf32> to vector<1x128xf32>
    %c0_70 = arith.constant 0 : index
    %c3_71 = arith.constant 3 : index
    %c0_72 = arith.constant 0 : index
    %361 = vector.load %arg11[%c0_70, %c3_71, %c0_72] : memref<2x16x128xf32, #tpu.memory_space<vmem>>, vector<1x1x128xf32>
    %362 = vector.shape_cast %361 : vector<1x1x128xf32> to vector<1x128xf32>
    %363 = vector.shape_cast %360 : vector<1x128xf32> to vector<1x1x128xf32>
    tpu.vector_store %arg11[%c0_70, %c3_71, %c0_72], %363 {strides = array<i32>} : memref<2x16x128xf32, #tpu.memory_space<vmem>>, vector<1x1x128xf32>,
    %364 = vector.extract_strided_slice %335 {offsets = [7, 0], sizes = [1, 128], strides = [1, 1]} : vector<32x128xf32> to vector<1x128xf32>
    %c1_73 = arith.constant 1 : index
    %c3_74 = arith.constant 3 : index
    %c0_75 = arith.constant 0 : index
    %365 = vector.load %arg11[%c1_73, %c3_74, %c0_75] : memref<2x16x128xf32, #tpu.memory_space<vmem>>, vector<1x1x128xf32>
    %366 = vector.shape_cast %365 : vector<1x1x128xf32> to vector<1x128xf32>
    %367 = vector.shape_cast %364 : vector<1x128xf32> to vector<1x1x128xf32>
    tpu.vector_store %arg11[%c1_73, %c3_74, %c0_75], %367 {strides = array<i32>} : memref<2x16x128xf32, #tpu.memory_space<vmem>>, vector<1x1x128xf32>,
    %368 = vector.extract_strided_slice %335 {offsets = [8, 0], sizes = [1, 128], strides = [1, 1]} : vector<32x128xf32> to vector<1x128xf32>
    %c0_76 = arith.constant 0 : index
    %c4_77 = arith.constant 4 : index
    %c0_78 = arith.constant 0 : index
    %369 = vector.load %arg11[%c0_76, %c4_77, %c0_78] : memref<2x16x128xf32, #tpu.memory_space<vmem>>, vector<1x1x128xf32>
    %370 = vector.shape_cast %369 : vector<1x1x128xf32> to vector<1x128xf32>
    %371 = vector.shape_cast %368 : vector<1x128xf32> to vector<1x1x128xf32>
    tpu.vector_store %arg11[%c0_76, %c4_77, %c0_78], %371 {strides = array<i32>} : memref<2x16x128xf32, #tpu.memory_space<vmem>>, vector<1x1x128xf32>,
    %372 = vector.extract_strided_slice %335 {offsets = [9, 0], sizes = [1, 128], strides = [1, 1]} : vector<32x128xf32> to vector<1x128xf32>
    %c1_79 = arith.constant 1 : index
    %c4_80 = arith.constant 4 : index
    %c0_81 = arith.constant 0 : index
    %373 = vector.load %arg11[%c1_79, %c4_80, %c0_81] : memref<2x16x128xf32, #tpu.memory_space<vmem>>, vector<1x1x128xf32>
    %374 = vector.shape_cast %373 : vector<1x1x128xf32> to vector<1x128xf32>
    %375 = vector.shape_cast %372 : vector<1x128xf32> to vector<1x1x128xf32>
    tpu.vector_store %arg11[%c1_79, %c4_80, %c0_81], %375 {strides = array<i32>} : memref<2x16x128xf32, #tpu.memory_space<vmem>>, vector<1x1x128xf32>,
    %376 = vector.extract_strided_slice %335 {offsets = [10, 0], sizes = [1, 128], strides = [1, 1]} : vector<32x128xf32> to vector<1x128xf32>
    %c0_82 = arith.constant 0 : index
    %c5 = arith.constant 5 : index
    %c0_83 = arith.constant 0 : index
    %377 = vector.load %arg11[%c0_82, %c5, %c0_83] : memref<2x16x128xf32, #tpu.memory_space<vmem>>, vector<1x1x128xf32>
    %378 = vector.shape_cast %377 : vector<1x1x128xf32> to vector<1x128xf32>
    %379 = vector.shape_cast %376 : vector<1x128xf32> to vector<1x1x128xf32>
    tpu.vector_store %arg11[%c0_82, %c5, %c0_83], %379 {strides = array<i32>} : memref<2x16x128xf32, #tpu.memory_space<vmem>>, vector<1x1x128xf32>,
    %380 = vector.extract_strided_slice %335 {offsets = [11, 0], sizes = [1, 128], strides = [1, 1]} : vector<32x128xf32> to vector<1x128xf32>
    %c1_84 = arith.constant 1 : index
    %c5_85 = arith.constant 5 : index
    %c0_86 = arith.constant 0 : index
    %381 = vector.load %arg11[%c1_84, %c5_85, %c0_86] : memref<2x16x128xf32, #tpu.memory_space<vmem>>, vector<1x1x128xf32>
    %382 = vector.shape_cast %381 : vector<1x1x128xf32> to vector<1x128xf32>
    %383 = vector.shape_cast %380 : vector<1x128xf32> to vector<1x1x128xf32>
    tpu.vector_store %arg11[%c1_84, %c5_85, %c0_86], %383 {strides = array<i32>} : memref<2x16x128xf32, #tpu.memory_space<vmem>>, vector<1x1x128xf32>,
    %384 = vector.extract_strided_slice %335 {offsets = [12, 0], sizes = [1, 128], strides = [1, 1]} : vector<32x128xf32> to vector<1x128xf32>
    %c0_87 = arith.constant 0 : index
    %c6_88 = arith.constant 6 : index
    %c0_89 = arith.constant 0 : index
    %385 = vector.load %arg11[%c0_87, %c6_88, %c0_89] : memref<2x16x128xf32, #tpu.memory_space<vmem>>, vector<1x1x128xf32>
    %386 = vector.shape_cast %385 : vector<1x1x128xf32> to vector<1x128xf32>
    %387 = vector.shape_cast %384 : vector<1x128xf32> to vector<1x1x128xf32>
    tpu.vector_store %arg11[%c0_87, %c6_88, %c0_89], %387 {strides = array<i32>} : memref<2x16x128xf32, #tpu.memory_space<vmem>>, vector<1x1x128xf32>,
    %388 = vector.extract_strided_slice %335 {offsets = [13, 0], sizes = [1, 128], strides = [1, 1]} : vector<32x128xf32> to vector<1x128xf32>
    %c1_90 = arith.constant 1 : index
    %c6_91 = arith.constant 6 : index
    %c0_92 = arith.constant 0 : index
    %389 = vector.load %arg11[%c1_90, %c6_91, %c0_92] : memref<2x16x128xf32, #tpu.memory_space<vmem>>, vector<1x1x128xf32>
    %390 = vector.shape_cast %389 : vector<1x1x128xf32> to vector<1x128xf32>
    %391 = vector.shape_cast %388 : vector<1x128xf32> to vector<1x1x128xf32>
    tpu.vector_store %arg11[%c1_90, %c6_91, %c0_92], %391 {strides = array<i32>} : memref<2x16x128xf32, #tpu.memory_space<vmem>>, vector<1x1x128xf32>,
    %392 = vector.extract_strided_slice %335 {offsets = [14, 0], sizes = [1, 128], strides = [1, 1]} : vector<32x128xf32> to vector<1x128xf32>
    %c0_93 = arith.constant 0 : index
    %c7 = arith.constant 7 : index
    %c0_94 = arith.constant 0 : index
    %393 = vector.load %arg11[%c0_93, %c7, %c0_94] : memref<2x16x128xf32, #tpu.memory_space<vmem>>, vector<1x1x128xf32>
    %394 = vector.shape_cast %393 : vector<1x1x128xf32> to vector<1x128xf32>
    %395 = vector.shape_cast %392 : vector<1x128xf32> to vector<1x1x128xf32>
    tpu.vector_store %arg11[%c0_93, %c7, %c0_94], %395 {strides = array<i32>} : memref<2x16x128xf32, #tpu.memory_space<vmem>>, vector<1x1x128xf32>,
    %396 = vector.extract_strided_slice %335 {offsets = [15, 0], sizes = [1, 128], strides = [1, 1]} : vector<32x128xf32> to vector<1x128xf32>
    %c1_95 = arith.constant 1 : index
    %c7_96 = arith.constant 7 : index
    %c0_97 = arith.constant 0 : index
    %397 = vector.load %arg11[%c1_95, %c7_96, %c0_97] : memref<2x16x128xf32, #tpu.memory_space<vmem>>, vector<1x1x128xf32>
    %398 = vector.shape_cast %397 : vector<1x1x128xf32> to vector<1x128xf32>
    %399 = vector.shape_cast %396 : vector<1x128xf32> to vector<1x1x128xf32>
    tpu.vector_store %arg11[%c1_95, %c7_96, %c0_97], %399 {strides = array<i32>} : memref<2x16x128xf32, #tpu.memory_space<vmem>>, vector<1x1x128xf32>,
    %400 = vector.extract_strided_slice %335 {offsets = [16, 0], sizes = [1, 128], strides = [1, 1]} : vector<32x128xf32> to vector<1x128xf32>
    %c0_98 = arith.constant 0 : index
    %c8_99 = arith.constant 8 : index
    %c0_100 = arith.constant 0 : index
    %401 = vector.load %arg11[%c0_98, %c8_99, %c0_100] : memref<2x16x128xf32, #tpu.memory_space<vmem>>, vector<1x1x128xf32>
    %402 = vector.shape_cast %401 : vector<1x1x128xf32> to vector<1x128xf32>
    %403 = vector.shape_cast %400 : vector<1x128xf32> to vector<1x1x128xf32>
    tpu.vector_store %arg11[%c0_98, %c8_99, %c0_100], %403 {strides = array<i32>} : memref<2x16x128xf32, #tpu.memory_space<vmem>>, vector<1x1x128xf32>,
    %404 = vector.extract_strided_slice %335 {offsets = [17, 0], sizes = [1, 128], strides = [1, 1]} : vector<32x128xf32> to vector<1x128xf32>
    %c1_101 = arith.constant 1 : index
    %c8_102 = arith.constant 8 : index
    %c0_103 = arith.constant 0 : index
    %405 = vector.load %arg11[%c1_101, %c8_102, %c0_103] : memref<2x16x128xf32, #tpu.memory_space<vmem>>, vector<1x1x128xf32>
    %406 = vector.shape_cast %405 : vector<1x1x128xf32> to vector<1x128xf32>
    %407 = vector.shape_cast %404 : vector<1x128xf32> to vector<1x1x128xf32>
    tpu.vector_store %arg11[%c1_101, %c8_102, %c0_103], %407 {strides = array<i32>} : memref<2x16x128xf32, #tpu.memory_space<vmem>>, vector<1x1x128xf32>,
    %408 = vector.extract_strided_slice %335 {offsets = [18, 0], sizes = [1, 128], strides = [1, 1]} : vector<32x128xf32> to vector<1x128xf32>
    %c0_104 = arith.constant 0 : index
    %c9 = arith.constant 9 : index
    %c0_105 = arith.constant 0 : index
    %409 = vector.load %arg11[%c0_104, %c9, %c0_105] : memref<2x16x128xf32, #tpu.memory_space<vmem>>, vector<1x1x128xf32>
    %410 = vector.shape_cast %409 : vector<1x1x128xf32> to vector<1x128xf32>
    %411 = vector.shape_cast %408 : vector<1x128xf32> to vector<1x1x128xf32>
    tpu.vector_store %arg11[%c0_104, %c9, %c0_105], %411 {strides = array<i32>} : memref<2x16x128xf32, #tpu.memory_space<vmem>>, vector<1x1x128xf32>,
    %412 = vector.extract_strided_slice %335 {offsets = [19, 0], sizes = [1, 128], strides = [1, 1]} : vector<32x128xf32> to vector<1x128xf32>
    %c1_106 = arith.constant 1 : index
    %c9_107 = arith.constant 9 : index
    %c0_108 = arith.constant 0 : index
    %413 = vector.load %arg11[%c1_106, %c9_107, %c0_108] : memref<2x16x128xf32, #tpu.memory_space<vmem>>, vector<1x1x128xf32>
    %414 = vector.shape_cast %413 : vector<1x1x128xf32> to vector<1x128xf32>
    %415 = vector.shape_cast %412 : vector<1x128xf32> to vector<1x1x128xf32>
    tpu.vector_store %arg11[%c1_106, %c9_107, %c0_108], %415 {strides = array<i32>} : memref<2x16x128xf32, #tpu.memory_space<vmem>>, vector<1x1x128xf32>,
    %416 = vector.extract_strided_slice %335 {offsets = [20, 0], sizes = [1, 128], strides = [1, 1]} : vector<32x128xf32> to vector<1x128xf32>
    %c0_109 = arith.constant 0 : index
    %c10_110 = arith.constant 10 : index
    %c0_111 = arith.constant 0 : index
    %417 = vector.load %arg11[%c0_109, %c10_110, %c0_111] : memref<2x16x128xf32, #tpu.memory_space<vmem>>, vector<1x1x128xf32>
    %418 = vector.shape_cast %417 : vector<1x1x128xf32> to vector<1x128xf32>
    %419 = vector.shape_cast %416 : vector<1x128xf32> to vector<1x1x128xf32>
    tpu.vector_store %arg11[%c0_109, %c10_110, %c0_111], %419 {strides = array<i32>} : memref<2x16x128xf32, #tpu.memory_space<vmem>>, vector<1x1x128xf32>,
    %420 = vector.extract_strided_slice %335 {offsets = [21, 0], sizes = [1, 128], strides = [1, 1]} : vector<32x128xf32> to vector<1x128xf32>
    %c1_112 = arith.constant 1 : index
    %c10_113 = arith.constant 10 : index
    %c0_114 = arith.constant 0 : index
    %421 = vector.load %arg11[%c1_112, %c10_113, %c0_114] : memref<2x16x128xf32, #tpu.memory_space<vmem>>, vector<1x1x128xf32>
    %422 = vector.shape_cast %421 : vector<1x1x128xf32> to vector<1x128xf32>
    %423 = vector.shape_cast %420 : vector<1x128xf32> to vector<1x1x128xf32>
    tpu.vector_store %arg11[%c1_112, %c10_113, %c0_114], %423 {strides = array<i32>} : memref<2x16x128xf32, #tpu.memory_space<vmem>>, vector<1x1x128xf32>,
    %424 = vector.extract_strided_slice %335 {offsets = [22, 0], sizes = [1, 128], strides = [1, 1]} : vector<32x128xf32> to vector<1x128xf32>
    %c0_115 = arith.constant 0 : index
    %c11 = arith.constant 11 : index
    %c0_116 = arith.constant 0 : index
    %425 = vector.load %arg11[%c0_115, %c11, %c0_116] : memref<2x16x128xf32, #tpu.memory_space<vmem>>, vector<1x1x128xf32>
    %426 = vector.shape_cast %425 : vector<1x1x128xf32> to vector<1x128xf32>
    %427 = vector.shape_cast %424 : vector<1x128xf32> to vector<1x1x128xf32>
    tpu.vector_store %arg11[%c0_115, %c11, %c0_116], %427 {strides = array<i32>} : memref<2x16x128xf32, #tpu.memory_space<vmem>>, vector<1x1x128xf32>,
    %428 = vector.extract_strided_slice %335 {offsets = [23, 0], sizes = [1, 128], strides = [1, 1]} : vector<32x128xf32> to vector<1x128xf32>
    %c1_117 = arith.constant 1 : index
    %c11_118 = arith.constant 11 : index
    %c0_119 = arith.constant 0 : index
    %429 = vector.load %arg11[%c1_117, %c11_118, %c0_119] : memref<2x16x128xf32, #tpu.memory_space<vmem>>, vector<1x1x128xf32>
    %430 = vector.shape_cast %429 : vector<1x1x128xf32> to vector<1x128xf32>
    %431 = vector.shape_cast %428 : vector<1x128xf32> to vector<1x1x128xf32>
    tpu.vector_store %arg11[%c1_117, %c11_118, %c0_119], %431 {strides = array<i32>} : memref<2x16x128xf32, #tpu.memory_space<vmem>>, vector<1x1x128xf32>,
    %432 = vector.extract_strided_slice %335 {offsets = [24, 0], sizes = [1, 128], strides = [1, 1]} : vector<32x128xf32> to vector<1x128xf32>
    %c0_120 = arith.constant 0 : index
    %c12_121 = arith.constant 12 : index
    %c0_122 = arith.constant 0 : index
    %433 = vector.load %arg11[%c0_120, %c12_121, %c0_122] : memref<2x16x128xf32, #tpu.memory_space<vmem>>, vector<1x1x128xf32>
    %434 = vector.shape_cast %433 : vector<1x1x128xf32> to vector<1x128xf32>
    %435 = vector.shape_cast %432 : vector<1x128xf32> to vector<1x1x128xf32>
    tpu.vector_store %arg11[%c0_120, %c12_121, %c0_122], %435 {strides = array<i32>} : memref<2x16x128xf32, #tpu.memory_space<vmem>>, vector<1x1x128xf32>,
    %436 = vector.extract_strided_slice %335 {offsets = [25, 0], sizes = [1, 128], strides = [1, 1]} : vector<32x128xf32> to vector<1x128xf32>
    %c1_123 = arith.constant 1 : index
    %c12_124 = arith.constant 12 : index
    %c0_125 = arith.constant 0 : index
    %437 = vector.load %arg11[%c1_123, %c12_124, %c0_125] : memref<2x16x128xf32, #tpu.memory_space<vmem>>, vector<1x1x128xf32>
    %438 = vector.shape_cast %437 : vector<1x1x128xf32> to vector<1x128xf32>
    %439 = vector.shape_cast %436 : vector<1x128xf32> to vector<1x1x128xf32>
    tpu.vector_store %arg11[%c1_123, %c12_124, %c0_125], %439 {strides = array<i32>} : memref<2x16x128xf32, #tpu.memory_space<vmem>>, vector<1x1x128xf32>,
    %440 = vector.extract_strided_slice %335 {offsets = [26, 0], sizes = [1, 128], strides = [1, 1]} : vector<32x128xf32> to vector<1x128xf32>
    %c0_126 = arith.constant 0 : index
    %c13 = arith.constant 13 : index
    %c0_127 = arith.constant 0 : index
    %441 = vector.load %arg11[%c0_126, %c13, %c0_127] : memref<2x16x128xf32, #tpu.memory_space<vmem>>, vector<1x1x128xf32>
    %442 = vector.shape_cast %441 : vector<1x1x128xf32> to vector<1x128xf32>
    %443 = vector.shape_cast %440 : vector<1x128xf32> to vector<1x1x128xf32>
    tpu.vector_store %arg11[%c0_126, %c13, %c0_127], %443 {strides = array<i32>} : memref<2x16x128xf32, #tpu.memory_space<vmem>>, vector<1x1x128xf32>,
    %444 = vector.extract_strided_slice %335 {offsets = [27, 0], sizes = [1, 128], strides = [1, 1]} : vector<32x128xf32> to vector<1x128xf32>
    %c1_128 = arith.constant 1 : index
    %c13_129 = arith.constant 13 : index
    %c0_130 = arith.constant 0 : index
    %445 = vector.load %arg11[%c1_128, %c13_129, %c0_130] : memref<2x16x128xf32, #tpu.memory_space<vmem>>, vector<1x1x128xf32>
    %446 = vector.shape_cast %445 : vector<1x1x128xf32> to vector<1x128xf32>
    %447 = vector.shape_cast %444 : vector<1x128xf32> to vector<1x1x128xf32>
    tpu.vector_store %arg11[%c1_128, %c13_129, %c0_130], %447 {strides = array<i32>} : memref<2x16x128xf32, #tpu.memory_space<vmem>>, vector<1x1x128xf32>,
    %448 = vector.extract_strided_slice %335 {offsets = [28, 0], sizes = [1, 128], strides = [1, 1]} : vector<32x128xf32> to vector<1x128xf32>
    %c0_131 = arith.constant 0 : index
    %c14_132 = arith.constant 14 : index
    %c0_133 = arith.constant 0 : index
    %449 = vector.load %arg11[%c0_131, %c14_132, %c0_133] : memref<2x16x128xf32, #tpu.memory_space<vmem>>, vector<1x1x128xf32>
    %450 = vector.shape_cast %449 : vector<1x1x128xf32> to vector<1x128xf32>
    %451 = vector.shape_cast %448 : vector<1x128xf32> to vector<1x1x128xf32>
    tpu.vector_store %arg11[%c0_131, %c14_132, %c0_133], %451 {strides = array<i32>} : memref<2x16x128xf32, #tpu.memory_space<vmem>>, vector<1x1x128xf32>,
    %452 = vector.extract_strided_slice %335 {offsets = [29, 0], sizes = [1, 128], strides = [1, 1]} : vector<32x128xf32> to vector<1x128xf32>
    %c1_134 = arith.constant 1 : index
    %c14_135 = arith.constant 14 : index
    %c0_136 = arith.constant 0 : index
    %453 = vector.load %arg11[%c1_134, %c14_135, %c0_136] : memref<2x16x128xf32, #tpu.memory_space<vmem>>, vector<1x1x128xf32>
    %454 = vector.shape_cast %453 : vector<1x1x128xf32> to vector<1x128xf32>
    %455 = vector.shape_cast %452 : vector<1x128xf32> to vector<1x1x128xf32>
    tpu.vector_store %arg11[%c1_134, %c14_135, %c0_136], %455 {strides = array<i32>} : memref<2x16x128xf32, #tpu.memory_space<vmem>>, vector<1x1x128xf32>,
    %456 = vector.extract_strided_slice %335 {offsets = [30, 0], sizes = [1, 128], strides = [1, 1]} : vector<32x128xf32> to vector<1x128xf32>
    %c0_137 = arith.constant 0 : index
    %c15 = arith.constant 15 : index
    %c0_138 = arith.constant 0 : index
    %457 = vector.load %arg11[%c0_137, %c15, %c0_138] : memref<2x16x128xf32, #tpu.memory_space<vmem>>, vector<1x1x128xf32>
    %458 = vector.shape_cast %457 : vector<1x1x128xf32> to vector<1x128xf32>
    %459 = vector.shape_cast %456 : vector<1x128xf32> to vector<1x1x128xf32>
    tpu.vector_store %arg11[%c0_137, %c15, %c0_138], %459 {strides = array<i32>} : memref<2x16x128xf32, #tpu.memory_space<vmem>>, vector<1x1x128xf32>,
    %460 = vector.extract_strided_slice %335 {offsets = [31, 0], sizes = [1, 128], strides = [1, 1]} : vector<32x128xf32> to vector<1x128xf32>
    %c1_139 = arith.constant 1 : index
    %c15_140 = arith.constant 15 : index
    %c0_141 = arith.constant 0 : index
    %461 = vector.load %arg11[%c1_139, %c15_140, %c0_141] : memref<2x16x128xf32, #tpu.memory_space<vmem>>, vector<1x1x128xf32>
    %462 = vector.shape_cast %461 : vector<1x1x128xf32> to vector<1x128xf32>
    %463 = vector.shape_cast %460 : vector<1x128xf32> to vector<1x1x128xf32>
    tpu.vector_store %arg11[%c1_139, %c15_140, %c0_141], %463 {strides = array<i32>} : memref<2x16x128xf32, #tpu.memory_space<vmem>>, vector<1x1x128xf32>,
    return
  }
  func.func @transform_0(%arg0: i32) -> (i32, i32) {
    %c0_i32 = arith.constant 0 : i32
    %c0_i32_0 = arith.constant 0 : i32
    %c0_i32_1 = arith.constant 0 : i32
    return %c0_i32, %c0_i32_0 : i32, i32
  }
  func.func @transform_1(%arg0: i32) -> (i32, i32) {
    %c0_i32 = arith.constant 0 : i32
    %c0_i32_0 = arith.constant 0 : i32
    %c0_i32_1 = arith.constant 0 : i32
    return %c0_i32, %c0_i32_0 : i32, i32
  }
  func.func @transform_2(%arg0: i32) -> (i32, i32) {
    %c0_i32 = arith.constant 0 : i32
    %c0_i32_0 = arith.constant 0 : i32
    %c0_i32_1 = arith.constant 0 : i32
    return %c0_i32, %c0_i32_0 : i32, i32
  }
  func.func @transform_3(%arg0: i32) -> (i32, i32) {
    %c0_i32 = arith.constant 0 : i32
    %c0_i32_0 = arith.constant 0 : i32
    %c0_i32_1 = arith.constant 0 : i32
    return %c0_i32, %c0_i32_0 : i32, i32
  }
  func.func @transform_4(%arg0: i32) -> (i32, i32) {
    %c0_i32 = arith.constant 0 : i32
    %c0_i32_0 = arith.constant 0 : i32
    %c0_i32_1 = arith.constant 0 : i32
    return %c0_i32, %c0_i32_0 : i32, i32
  }
  func.func @transform_5(%arg0: i32) -> (i32, i32) {
    %c0_i32 = arith.constant 0 : i32
    %c0_i32_0 = arith.constant 0 : i32
    %c0_i32_1 = arith.constant 0 : i32
    return %c0_i32, %c0_i32_0 : i32, i32
  }
  func.func @transform_6(%arg0: i32) -> (i32, i32) {
    %c0_i32 = arith.constant 0 : i32
    %c0_i32_0 = arith.constant 0 : i32
    %c0_i32_1 = arith.constant 0 : i32
    return %c0_i32, %c0_i32_0 : i32, i32
  }
  func.func @transform_7(%arg0: i32) -> (i32, i32) {
    %c0_i32 = arith.constant 0 : i32
    %c0_i32_0 = arith.constant 0 : i32
    %c0_i32_1 = arith.constant 0 : i32
    return %c0_i32, %c0_i32_0 : i32, i32
  }
  func.func @transform_8(%arg0: i32) -> (i32, i32) {
    %c0_i32 = arith.constant 0 : i32
    %c0_i32_0 = arith.constant 0 : i32
    %c0_i32_1 = arith.constant 0 : i32
    return %c0_i32, %c0_i32_0 : i32, i32
  }
  func.func @transform_9(%arg0: i32) -> (i32, i32) {
    %c0_i32 = arith.constant 0 : i32
    %c0_i32_0 = arith.constant 0 : i32
    %c0_i32_1 = arith.constant 0 : i32
    return %c0_i32, %c0_i32_0 : i32, i32
  }
  func.func @transform_10(%arg0: i32) -> (i32, i32, i32) {
    %c0_i32 = arith.constant 0 : i32
    %c0_i32_0 = arith.constant 0 : i32
    %c0_i32_1 = arith.constant 0 : i32
    %c0_i32_2 = arith.constant 0 : i32
    return %c0_i32, %c0_i32_0, %c0_i32_1 : i32, i32, i32
  }
}

</mosaic_0001>

<bundles_post_ra>
// kernel: mamba_block_pallas.1
= control target key start
LH: loop header
LB: loop body
LE: loop exit
PB: predicated region body
PF: predicated region fallthrough
CT: control target
= control target key end

     0   :  { %15 = vsyncpa [#allocation4], 0  ;;  %s1975_s0 = inlined_call_operand.vmem [shape: f32[32,128], index: 0, kind: input, shape index: {}]   ;;  %s1976_s1 = inlined_call_operand.hbm [shape: bf16[128,256], index: 1, kind: input, shape index: {}]   ;;  %s1977_s2 = inlined_call_operand.vmem [shape: f32[4,128], index: 2, kind: input, shape index: {}]   ;;  %s1978_s3 = inlined_call_operand.vmem [shape: f32[1,128], index: 3, kind: input, shape index: {}]   ;;  %s1979_s4 = inlined_call_operand.vmem [shape: bf16[128,12], index: 4, kind: input, shape index: {}]   ;;  %s1980_s5 = inlined_call_operand.hbm [shape: bf16[8,128], index: 5, kind: input, shape index: {}]   ;;  %s1981_s6 = inlined_call_operand.hbm [shape: f32[1,128], index: 6, kind: input, shape index: {}]   ;;  %s1982_s7 = inlined_call_operand.hbm [shape: f32[2,128], index: 7, kind: input, shape index: {}]   ;;  %s1983_s8 = inlined_call_operand.hbm [shape: f32[1,128], index: 8, kind: input, shape index: {}]   ;;  %s1984_s9 = inlined_call_operand.vmem [shape: bf16[128,128], index: 9, kind: input, shape index: {}]   ;;  %s1985_s10 = inlined_call_operand.hbm [shape: f32[2,16,128], index: 10, kind: output, shape index: {}]  }
   0x1   :  { %16 = vsyncpa [#allocation7], 0 }
   0x2   :  { %17 = vsyncpa [#allocation10], 0 }
   0x3   :  { %18 = vsyncpa [#allocation5], 0  ;;  %s1585_s13 = smov [#allocation6]   ;;  %s1586_s15 = smov [#allocation9]  }
   0x4   :  { %s45_s14 = sshll.u32 %s1585_s13, 4  ;;  %s65_s16 = sshll.u32 %s1586_s15, 4  ;;  %s46_s14 = int_to_ptr.vmem [resolvable:$true] %s45_s14  ;;  %s66_s16 = int_to_ptr.vmem [resolvable:$true] %s65_s16 }
   0x5   :  { %s1445_s19 = scalar_lea.hbm %s1980_s5, 64 }
   0x6   :  { %p1446_p0 = scmp.ne.s32.totalorder %s1980_s5, %s1445_s19  ;;  %p1449_p1 = scmp.lt.u32.totalorder %s1445_s19, %s1980_s5 }
   0x8   :  { %p1451_p2 = pnand %p1449_p1, %p1446_p0 }
   0xa   :  { %1454 = shalt.err (!%p1451_p2)
}
   0xb   :  { %s1455_s24 = scalar_lea.vmem %s46_s14, 64  ;;  %p1460_p4 = scmp.lt.s32.totalorder %s46_s14, %s46_s14 }
   0xc   :  { %p1456_p3 = scmp.ne.s32.totalorder %s46_s14, %s1455_s24  ;;  %p1461_p5 = scmp.lt.s32.totalorder %s1455_s24, %s1455_s24 }
   0xe   :  { %p1462_p6 = por %p1461_p5, %p1460_p4 }
  0x10   :  { %p1463_p7 = pnand %p1462_p6, %p1456_p3 }
  0x12   :  { %1466 = shalt.err (!%p1463_p7)
}
  0x13   :  { %48 = dma.hbm_to_vmem [thread:$0]  %s1980_s5, 64, %s46_s14, [#allocation7]  }
  0x14   :  { %s1467_s29 = scalar_lea.hbm %s1982_s7, 32 }
  0x15   :  { %p1468_p8 = scmp.ne.s32.totalorder %s1982_s7, %s1467_s29  ;;  %p1471_p9 = scmp.lt.u32.totalorder %s1467_s29, %s1982_s7 }
  0x17   :  { %p1473_p10 = pnand %p1471_p9, %p1468_p8 }
  0x19   :  { %1476 = shalt.err (!%p1473_p10)
}
  0x1a   :  { %s1477_s15 = scalar_lea.vmem %s66_s16, 32  ;;  %p1482_p12 = scmp.lt.s32.totalorder %s66_s16, %s66_s16 }
  0x1b   :  { %p1478_p11 = scmp.ne.s32.totalorder %s66_s16, %s1477_s15  ;;  %p1483_p13 = scmp.lt.s32.totalorder %s1477_s15, %s1477_s15 }
  0x1d   :  { %p1484_p0 = por %p1483_p13, %p1482_p12 }
  0x1f   :  { %p1485_p1 = pnand %p1484_p0, %p1478_p11 }
  0x21   :  { %1488 = shalt.err (!%p1485_p1)
}
  0x22   :  { %68 = dma.hbm_to_vmem [thread:$0]  %s1982_s7, 32, %s66_s16, [#allocation10]  }
  0x23   :  { %s1587_s17 = smov [#allocation3]   ;;  %s1489_s21 = scalar_lea.hbm %s1976_s1, 2048 }
  0x24   :  { %s26_s18 = sshll.u32 %s1587_s17, 4  ;;  %p1490_p2 = scmp.ne.s32.totalorder %s1976_s1, %s1489_s21  ;;  %s27_s18 = int_to_ptr.vmem [resolvable:$true] %s26_s18 }
  0x25   :  { %p1493_p3 = scmp.lt.u32.totalorder %s1489_s21, %s1976_s1 }
  0x27   :  { %p1495_p4 = pnand %p1493_p3, %p1490_p2 }
  0x29   :  { %1498 = shalt.err (!%p1495_p4)
}
  0x2a   :  { %s1499_s26 = scalar_lea.vmem %s27_s18, 2048  ;;  %p1504_p6 = scmp.lt.s32.totalorder %s27_s18, %s27_s18 }
  0x2b   :  { %p1500_p5 = scmp.ne.s32.totalorder %s27_s18, %s1499_s26  ;;  %p1505_p7 = scmp.lt.s32.totalorder %s1499_s26, %s1499_s26 }
  0x2d   :  { %p1506_p8 = por %p1505_p7, %p1504_p6 }
  0x2f   :  { %p1507_p9 = pnand %p1506_p8, %p1500_p5 }
  0x31   :  { %1510 = shalt.err (!%p1507_p9)
}
  0x32   :  { %s1588_s7 = smov 128   ;;  %s1589_s16 = smov 8  }
  0x33   :  { %32 = dma.hbm_to_vmem [thread:$0]  %s1976_s1, 2048, %s27_s18, [#allocation4], %s1588_s7, %s1588_s7, %s1589_s16  }
  0x34   :  { %s1590_s29 = smov [#allocation8]   ;;  %s1591_s11 = smov [#allocation11]  }
  0x35   :  { %s55_s30 = sshll.u32 %s1590_s29, 4  ;;  %s75_s12 = sshll.u32 %s1591_s11, 4  ;;  %s56_s30 = int_to_ptr.vmem [resolvable:$true] %s55_s30  ;;  %s76_s12 = int_to_ptr.vmem [resolvable:$true] %s75_s12 }
  0x36   :  { %s1511_s5 = scalar_lea.hbm %s1981_s6, 16 }
  0x37   :  { %p1512_p10 = scmp.ne.s32.totalorder %s1981_s6, %s1511_s5  ;;  %p1515_p11 = scmp.lt.u32.totalorder %s1511_s5, %s1981_s6 }
  0x39   :  { %p1517_p12 = pnand %p1515_p11, %p1512_p10 }
  0x3b   :  { %1520 = shalt.err (!%p1517_p12)
}
  0x3c   :  { %s1521_s1 = scalar_lea.vmem %s56_s30, 16  ;;  %s1525_s18 = scalar_lea.vmem %s56_s30, 32 }
  0x3d   :  { %p1522_p13 = scmp.ne.s32.totalorder %s56_s30, %s1521_s1  ;;  %p1526_p0 = scmp.lt.s32.totalorder %s56_s30, %s56_s30 }
  0x3e   :  { %p1527_p1 = scmp.lt.s32.totalorder %s1525_s18, %s1521_s1 }
  0x40   :  { %p1528_p2 = por %p1527_p1, %p1526_p0 }
  0x42   :  { %p1529_p3 = pnand %p1528_p2, %p1522_p13 }
  0x44   :  { %1532 = shalt.err (!%p1529_p3)
}
  0x45   :  { %58 = dma.hbm_to_vmem [thread:$0]  %s1981_s6, 16, %s56_s30, [#allocation7]  }
  0x46   :  { %s1533_s25 = scalar_lea.hbm %s1983_s8, 16 }
  0x47   :  { %p1534_p4 = scmp.ne.s32.totalorder %s1983_s8, %s1533_s25  ;;  %p1537_p5 = scmp.lt.u32.totalorder %s1533_s25, %s1983_s8 }
  0x49   :  { %p1539_p6 = pnand %p1537_p5, %p1534_p4 }
  0x4b   :  { %1542 = shalt.err (!%p1539_p6)
}
  0x4c   :  { %s1543_s11 = scalar_lea.vmem %s76_s12, 16  ;;  %s1547_s13 = scalar_lea.vmem %s76_s12, 32 }
  0x4d   :  { %p1544_p7 = scmp.ne.s32.totalorder %s76_s12, %s1543_s11  ;;  %p1548_p8 = scmp.lt.s32.totalorder %s76_s12, %s76_s12 }
  0x4e   :  { %p1549_p9 = scmp.lt.s32.totalorder %s1547_s13, %s1543_s11 }
  0x50   :  { %p1550_p10 = por %p1549_p9, %p1548_p8 }
  0x52   :  { %p1551_p11 = pnand %p1550_p10, %p1544_p7 }
  0x54   :  { %1554 = shalt.err (!%p1551_p11)
}
  0x55   :  { %78 = dma.hbm_to_vmem [thread:$0]  %s1983_s8, 16, %s76_s12, [#allocation10]  }
  0x56   :  { %1577 = dma.done.wait [#allocation4], 2048  }
  0x57   :  { %1578 = vsyncadd [#allocation4], 4294965248 }
  0x58   :  { %1579 = dma.done.wait [#allocation7], 80  }
  0x59   :  { %1580 = vsyncadd [#allocation7], 4294967216 }
  0x5a   :  { %1581 = dma.done.wait [#allocation10], 48  }
  0x5b   :  { %1582 = vsyncadd [#allocation10], 4294967248  ;;  %v1592_v0 = vmov 0   ;;  %v1341_v1 = vld [vmem:[#allocation3 + $0x4] ss:$8 sps:$4 sm:$0xff]   ;;  %v99_v20 = vld [vmem:[%s1975_s0 + $0x10] sm:$0xff] }
  0x5c   :  { %231 = vmatprep.mubr.bf16.mxu0 %v1592_v0  ;;  %v1343_v2 = vld [vmem:[#allocation3] ss:$8 sps:$4 sm:$0xff]   ;;  %199 = vmatprep.subr.bf16.mxu0 %v1341_v1  ;;  %v1344_v3 = vld [vmem:[#allocation3 + $0x14] ss:$8 sps:$4 sm:$0xff]   ;;  %v1346_v4 = vld [vmem:[#allocation3 + $0x10] ss:$8 sps:$4 sm:$0xff]  }
  0x5d   :  { %200 = vmatpush1.bf16.msra.mxu0 %v1343_v2  ;;  %v1347_v5 = vld [vmem:[#allocation3 + $0x24] ss:$8 sps:$4 sm:$0xff]   ;;  %v1349_v6 = vld [vmem:[#allocation3 + $0x20] ss:$8 sps:$4 sm:$0xff]   ;;  %v1350_v7 = vld [vmem:[#allocation3 + $0x34] ss:$8 sps:$4 sm:$0xff]  }
  0x5e   :  { %201 = vmatprep.subr.bf16.mxu0 %v1344_v3  ;;  %v1352_v8 = vld [vmem:[#allocation3 + $0x30] ss:$8 sps:$4 sm:$0xff]   ;;  %v1353_v9 = vld [vmem:[#allocation3 + $0x44] ss:$8 sps:$4 sm:$0xff]   ;;  %v1355_v10 = vld [vmem:[#allocation3 + $0x40] ss:$8 sps:$4 sm:$0xff]  }
  0x5f   :  { %v1356_v11 = vld [vmem:[#allocation3 + $0x54] ss:$8 sps:$4 sm:$0xff]   ;;  %v1358_v12 = vld [vmem:[#allocation3 + $0x50] ss:$8 sps:$4 sm:$0xff]   ;;  %v1359_v13 = vld [vmem:[#allocation3 + $0x64] ss:$8 sps:$4 sm:$0xff]  }
  0x60   :  { %v1361_v14 = vld [vmem:[#allocation3 + $0x60] ss:$8 sps:$4 sm:$0xff]   ;;  %v1362_v15 = vld [vmem:[#allocation3 + $0x74] ss:$8 sps:$4 sm:$0xff]   ;;  %v1364_v16 = vld [vmem:[#allocation3 + $0x70] ss:$8 sps:$4 sm:$0xff]  }
  0x61   :  { %202 = vmatpush1.bf16.msra.mxu0 %v1346_v4  ;;  %v97_v17 = vld [vmem:[%s1975_s0] sm:$0xff]  ;;  %v98_v18 = vld [vmem:[%s1975_s0 + $0x8] sm:$0xff]  ;;  %v100_v21 = vld [vmem:[%s1975_s0 + $0x18] sm:$0xff]  ;;  %vm337_vm0 = vcmask 1043456   ;;  %vm256_vm1 = vcmask 1045504   ;;  %vm521_vm2 = vcmask 64512  }
  0x62   :  { %203 = vmatprep.subr.bf16.mxu0 %v1347_v5  ;;  %v101_v19 = vpack.c.bf16 %v98_v18, %v97_v17  ;;  %v102_v22 = vpack.c.bf16 %v100_v21, %v99_v20  ;;  %v1365_v23 = vld [vmem:[%s1979_s4] sm:$0xff]   ;;  %v1366_v24 = vld [vmem:[%s1979_s4 + $0x8] sm:$0xff]   ;;  %v1367_v25 = vld [vmem:[%s1979_s4 + $0x10] sm:$0xff]  }
  0x63   :  { %1269 = vmatprep.subr.bf16.mxu1 %v1365_v23  ;;  %v1368_v26 = vld [vmem:[%s1979_s4 + $0x18] sm:$0xff]   ;;  %v1369_v27 = vld [vmem:[%s1979_s4 + $0x20] sm:$0xff]   ;;  %v1370_v28 = vld [vmem:[%s1979_s4 + $0x28] sm:$0xff]  }
  0x64   :  { %1270 = vmatpush3.bf16.msra.mxu1 %v1365_v23  ;;  %v1371_v29 = vld [vmem:[%s1979_s4 + $0x30] sm:$0xff]   ;;  %v1372_v30 = vld [vmem:[%s1979_s4 + $0x38] sm:$0xff]   ;;  %v1752_v31 = vld [vmem:[#allocation6] sm:$0xf] }
  0x65   :  { %204 = vmatpush1.bf16.msra.mxu0 %v1349_v6  ;;  %1271 = vmatprep.subr.bf16.mxu1 %v1366_v24  ;;  %v1215_v35 = vld [vmem:[%s1977_s2 + $0x1] ss:$0 sm:$0xff]  ;;  %v1214_v40 = vld [vmem:[%s1977_s2] ss:$0 sm:$0xff]  ;;  %v1216_v45 = vld [vmem:[%s1977_s2 + $0x2] ss:$0 sm:$0xff] }
  0x66   :  { %205 = vmatprep.subr.bf16.mxu0 %v1350_v7  ;;  %v1213_v47 = vld [vmem:[%s1978_s3] ss:$0 sm:$0xff]  ;;  %v1217_v3 = vld [vmem:[%s1977_s2 + $0x3] ss:$0 sm:$0xff] }
  0x68   :  { %1272 = vmatpush3.bf16.msra.mxu1 %v1366_v24 }
  0x69   :  { %206 = vmatpush1.bf16.msra.mxu0 %v1352_v8  ;;  %1273 = vmatprep.subr.bf16.mxu1 %v1367_v25 }
  0x6a   :  { %207 = vmatprep.subr.bf16.mxu0 %v1353_v9 }
  0x6c   :  { %1274 = vmatpush3.bf16.msra.mxu1 %v1367_v25 }
  0x6d   :  { %208 = vmatpush1.bf16.msra.mxu0 %v1355_v10  ;;  %1275 = vmatprep.subr.bf16.mxu1 %v1368_v26 }
  0x6e   :  { %209 = vmatprep.subr.bf16.mxu0 %v1356_v11 }
  0x70   :  { %1276 = vmatpush3.bf16.msra.mxu1 %v1368_v26 }
  0x71   :  { %210 = vmatpush1.bf16.msra.mxu0 %v1358_v12  ;;  %1277 = vmatprep.subr.bf16.mxu1 %v1369_v27 }
  0x72   :  { %211 = vmatprep.subr.bf16.mxu0 %v1359_v13 }
  0x74   :  { %1278 = vmatpush3.bf16.msra.mxu1 %v1369_v27 }
  0x75   :  { %212 = vmatpush1.bf16.msra.mxu0 %v1361_v14  ;;  %1279 = vmatprep.subr.bf16.mxu1 %v1370_v28 }
  0x76   :  { %213 = vmatprep.subr.bf16.mxu0 %v1362_v15 }
  0x78   :  { %1280 = vmatpush3.bf16.msra.mxu1 %v1370_v28 }
  0x79   :  { %214 = vmatpush1.bf16.msra.mxu0 %v1364_v16  ;;  %1281 = vmatprep.subr.bf16.mxu1 %v1371_v29 }
  0x7c   :  { %232 = vmatmul.mubr.bf16.vlgmr.msra.gmra.mrb[0].mxu0 %v101_v19  ;;  %1282 = vmatpush3.bf16.msra.mxu1 %v1371_v29 }
  0x7d   :  { %241 = vmatprep.mubr.bf16.mxu0 %v1592_v0  ;;  %1283 = vmatprep.subr.bf16.mxu1 %v1372_v30 }
  0x80   :  { %1284 = vmatpush3.bf16.msra.mxu1 %v1372_v30 }
  0x81   :  { %1315 = vmatprep.subr.msk.bf16.mxu1 %vm337_vm0, %v1752_v31 }
  0x84   :  { %242 = vmatmul.mubr.bf16.gmra.mrb[4].mxu0 %v102_v22 }
 0x14f   :  { %v233_v32 = vpop.f32.mrb[0].mxu0 }
 0x150   :  { %v257_v33 = vrot.slane %v233_v32, 2  ;;  %v1756_v34 = vpop.f32.mrb[1].mxu0  ;;  %v360_v16 = vmul.f32 %v1217_v3, %v233_v32 }
 0x151   :  { %v237_v36 = vpop.f32.mrb[2].mxu0 }
 0x152   :  { %v269_v37 = vsel %vm256_vm1, 0.0, %v257_v33  ;;  %v258_v38 = vrot.slane %v237_v36, 2  ;;  %v1762_v39 = vpop.f32.mrb[3].mxu0  ;;  %v361_v28 = vmul.f32 %v1217_v3, %v237_v36 }
 0x153   :  { %v295_v41 = vmul.f32 %v1215_v35, %v269_v37  ;;  %v282_v44 = vmul.f32 %v1214_v40, %v269_v37  ;;  %v327_v54 = vmul.f32 %v1216_v45, %v269_v37 }
 0x154   :  { %v259_v42 = vsel %vm256_vm1, %v257_v33, %v258_v38 }
 0x155   :  { %v296_v43 = vmul.f32 %v1215_v35, %v259_v42  ;;  %v305_v48 = vrot.slane %v295_v41, 2  ;;  %v328_v50 = vmul.f32 %v1216_v45, %v259_v42  ;;  %v286_v59 = vadd.f32 %v1213_v47, %v282_v44 }
 0x156   :  { %v283_v60 = vmul.f32 %v1214_v40, %v259_v42  ;;  %v338_v8 = vrot.slane %v327_v54, 4 }
 0x157   :  { %v243_v46 = vpop.f32.mrb[4].mxu0  ;;  %v306_v49 = vrot.slane %v296_v43, 2  ;;  %v339_v63 = vrot.slane %v328_v50, 4 }
 0x158   :  { %v260_v51 = vrot.slane %v243_v46, 2  ;;  %v1774_v52 = vpop.f32.mrb[5].mxu0  ;;  %v287_v14 = vadd.f32 %v1213_v47, %v283_v60  ;;  %v362_v33 = vmul.f32 %v1217_v3, %v243_v46 }
 0x159   :  { %v247_v53 = vpop.f32.mrb[6].mxu0  ;;  %v307_v58 = vsel %vm256_vm1, %v305_v48, %v306_v49  ;;  %v340_v22 = vsel %vm337_vm0, %v338_v8, %v339_v63 }
 0x15a   :  { %v261_v55 = vsel %vm256_vm1, %v258_v38, %v260_v51  ;;  %v262_v56 = vrot.slane %v247_v53, 2  ;;  %v1777_v57 = vpop.f32.mrb[7].mxu0  ;;  %v318_v19 = vadd.f32 %v307_v58, %v286_v59 }
 0x15b   :  { %v297_v61 = vmul.f32 %v1215_v35, %v261_v55  ;;  %v329_v62 = vmul.f32 %v1216_v45, %v261_v55  ;;  %v284_v4 = vmul.f32 %v1214_v40, %v261_v55 }
 0x15c   :  { %v263_v0 = vsel %vm256_vm1, %v260_v51, %v262_v56  ;;  %v299_v1 = vmul.f32 %v1215_v35, %v262_v56  ;;  %v331_v2 = vmul.f32 %v1216_v45, %v262_v56  ;;  %v351_v26 = vadd.f32 %v340_v22, %v318_v19 }
 0x15d   :  { %v308_v5 = vrot.slane %v297_v61, 2  ;;  %v341_v6 = vrot.slane %v329_v62, 4  ;;  %v285_v7 = vmul.f32 %v1214_v40, %v263_v0  ;;  %v298_v9 = vmul.f32 %v1215_v35, %v263_v0 }
 0x15e   :  { %v312_v10 = vrot.slane %v299_v1, 2  ;;  %v330_v11 = vmul.f32 %v1216_v45, %v263_v0  ;;  %v345_v13 = vrot.slane %v331_v2, 4  ;;  %v288_v20 = vadd.f32 %v1213_v47, %v284_v4 }
 0x15f   :  { %v289_v12 = vadd.f32 %v1213_v47, %v285_v7  ;;  %v309_v15 = vsel %vm256_vm1, %v306_v49, %v308_v5  ;;  %v310_v17 = vrot.slane %v298_v9, 2  ;;  %v342_v23 = vsel %vm337_vm0, %v339_v63, %v341_v6 }
 0x160   :  { %v343_v18 = vrot.slane %v330_v11, 4  ;;  %v319_v21 = vadd.f32 %v309_v15, %v287_v14  ;;  %v364_v35 = vadd.f32 %v360_v16, %v351_v26  ;;  %v363_v40 = vmul.f32 %v1217_v3, %v247_v53  ;;  %v1230_v14 = vld [vmem:[#allocation8] ss:$0 sm:$0xff] }
 0x161   :  { %v313_v24 = vsel %vm256_vm1, %v310_v17, %v312_v10  ;;  %v311_v27 = vsel %vm256_vm1, %v308_v5, %v310_v17  ;;  %v529_v4 = vsel %vm337_vm0, %v1752_v31, 0  ;;  %v1593_v5 = vmov 8  }
 0x162   :  { %v346_v25 = vsel %vm337_vm0, %v343_v18, %v345_v13  ;;  %v321_v29 = vadd.f32 %v313_v24, %v289_v12  ;;  %v352_v30 = vadd.f32 %v342_v23, %v319_v21  ;;  %v320_v32 = vadd.f32 %v311_v27, %v288_v20  ;;  %1329 = vset.pattern.permute.xlu0 %v1593_v5  ;;  %v1373_v27 = vld [vmem:[%s1984_s9] sm:$0xff]  }
 0x163   :  { %v344_v37 = vsel %vm337_vm0, %v341_v6, %v343_v18  ;;  %v1218_v43 = vmul.f32 -1.442695, %v364_v35  ;;  %1331 = vset.pattern.permute.xlu1 %v1593_v5  ;;  %v1594_v12 = vmov 9   ;;  %v1595_v31 = vmov 10   ;;  %1295 = vmatprep.subr.bf16.mxu0 %v1373_v27 }
 0x164   :  { %v354_v38 = vadd.f32 %v346_v25, %v321_v29  ;;  %v365_v41 = vadd.f32 %v361_v28, %v352_v30  ;;  %v353_v42 = vadd.f32 %v344_v37, %v320_v32  ;;  %v1596_v13 = vmov 11   ;;  %v1374_v28 = vld [vmem:[%s1984_s9 + $0x8] sm:$0xff]   ;;  %1296 = vmatpush3.bf16.msra.mxu0 %v1373_v27  ;;  %v1376_v37 = vld [vmem:[%s1984_s9 + $0x18] sm:$0xff]  }
 0x165   :  { %1381 = vpow2.f32 %v1218_v43  ;;  %1297 = vmatprep.subr.bf16.mxu0 %v1374_v28 }
 0x166   :  { %v367_v44 = vadd.f32 %v363_v40, %v354_v38  ;;  %v1219_v45 = vmul.f32 -1.442695, %v365_v41  ;;  %v366_v47 = vadd.f32 %v362_v33, %v353_v42  ;;  %v1375_v33 = vld [vmem:[%s1984_s9 + $0x10] sm:$0xff]   ;;  %v1377_v38 = vld [vmem:[%s1984_s9 + $0x20] sm:$0xff]  }
 0x168   :  { %v1221_v48 = vmul.f32 -1.442695, %v367_v44  ;;  %v1220_v49 = vmul.f32 -1.442695, %v366_v47  ;;  %1383 = vpow2.f32 %v1219_v45  ;;  %1298 = vmatpush3.bf16.msra.mxu0 %v1374_v28  ;;  %v653_v45 = vlaneseq }
 0x169   :  { %1299 = vmatprep.subr.bf16.mxu0 %v1375_v33 }
 0x16a   :  { %1385 = vpow2.f32 %v1221_v48 }
 0x16b   :  { %1387 = vpow2.f32 %v1220_v49 }
 0x16c   :  { %1300 = vmatpush3.bf16.msra.mxu0 %v1375_v33 }
 0x16d   :  { %1301 = vmatprep.subr.bf16.mxu0 %v1376_v37 }
 0x16f   :  { %v1382_v36 = vpop.eup %1381 }
 0x170   :  { %v380_v46 = vadd.f32 1.0, %v1382_v36  ;;  %1302 = vmatpush3.bf16.msra.mxu0 %v1376_v37 }
 0x171   :  { %1303 = vmatprep.subr.bf16.mxu0 %v1377_v38 }
 0x172   :  { %v1384_v50 = vpop.eup %1383  ;;  %1389 = vrcp.f32 %v380_v46  ;;  %v654_v46 = vshrl.u32 %v653_v45, 7 }
 0x173   :  { %v381_v54 = vadd.f32 1.0, %v1384_v50  ;;  %v1379_v50 = vld [vmem:[%s1984_s9 + $0x30] sm:$0xff]  }
 0x174   :  { %v1386_v51 = vpop.eup %1385  ;;  %1304 = vmatpush3.bf16.msra.mxu0 %v1377_v38 }
 0x175   :  { %v383_v55 = vadd.f32 1.0, %v1386_v51  ;;  %v1388_v53 = vpop.eup %1387  ;;  %1391 = vrcp.f32 %v381_v54 }
 0x176   :  { %v382_v56 = vadd.f32 1.0, %v1388_v53 }
 0x177   :  { %1393 = vrcp.f32 %v383_v55 }
 0x178   :  { %1395 = vrcp.f32 %v382_v56 }
 0x17c   :  { %v1390_v58 = vpop.eup %1389 }
 0x17d   :  { %v1791_v61 = vmul.f32 %v1390_v58, %v364_v35 }
 0x17f   :  { %v1392_v59 = vpop.eup %1391 }
 0x180   :  { %v1793_v62 = vmul.f32 %v1392_v59, %v365_v41  ;;  %v1380_v59 = vld [vmem:[%s1984_s9 + $0x38] sm:$0xff]  }
 0x181   :  { %v1394_v60 = vpop.eup %1393 }
 0x182   :  { %v1795_v63 = vmul.f32 %v1394_v60, %v367_v44  ;;  %v1396_v0 = vpop.eup %1395  ;;  %v396_v1 = vpack.c.bf16 %v1793_v62, %v1791_v61  ;;  %v1378_v44 = vld [vmem:[%s1984_s9 + $0x28] sm:$0xff]   ;;  %v655_v60 = vsub.s32 0, %v654_v46  ;;  %s1597_s9 = smov [#allocation12]  }
 0x183   :  { %v1799_v2 = vmul.f32 %v1396_v0, %v366_v47  ;;  %1305 = vmatprep.subr.bf16.mxu0 %v1378_v44  ;;  %s1183_s30 = sshll.u32 %s1597_s9, 4  ;;  %s1953_s30 = int_to_ptr.vmem [resolvable:$true] %s1183_s30 }
 0x184   :  { %1285 = vmatprep.mubr.bf16.mxu1 %v396_v1  ;;  %1306 = vmatpush3.bf16.msra.mxu0 %v1378_v44  ;;  %s1555_s8 = scalar_lea.vmem %s1953_s30, 512  ;;  %p1560_p13 = scmp.lt.s32.totalorder %s1953_s30, %s1953_s30 }
 0x185   :  { %v397_v3 = vpack.c.bf16 %v1795_v63, %v1799_v2  ;;  %1307 = vmatprep.subr.bf16.mxu0 %v1379_v50  ;;  %p1556_p12 = scmp.ne.s32.totalorder %s1953_s30, %s1555_s8  ;;  %p1561_p0 = scmp.lt.s32.totalorder %s1555_s8, %s1555_s8 }
 0x187   :  { %1286 = vmatmul.mubr.bf16.vlgmr.msra.gmra.mrb[0].mxu1 %v397_v3  ;;  %p1562_p1 = por %p1561_p0, %p1560_p13 }
 0x188   :  { %1290 = vmatpush3.bf16.msra.mxu1 %v529_v4  ;;  %v652_v4 = vld [vmem:[#allocation9] sm:$0x3]  ;;  %1308 = vmatpush3.bf16.msra.mxu0 %v1379_v50 }
 0x189   :  { %1309 = vmatprep.subr.bf16.mxu0 %v1380_v59  ;;  %p1563_p2 = pnand %p1562_p1, %p1556_p12 }
 0x18c   :  { %1310 = vmatpush3.bf16.msra.mxu0 %v1380_v59  ;;  %v1234_v59 = vmul.f32 -1.442695, %v1756_v34 }
 0x25a   :  { %v1287_v6 = vpop.f32.mrb[0].mxu1 }
 0x25b   :  { %v496_v7 = vpop.f32.mrb[1].mxu1 }
 0x25c   :  { %687 = vperm.xlu0 %1329, %v496_v7   ;;  %v1288_v8 = vpop.f32.mrb[2].mxu1 }
 0x25d   :  { %v512_v9 = vpack.c.bf16 %v1288_v8, %v1287_v6  ;;  %v499_v10 = vpop.f32.mrb[3].mxu1 }
 0x25e   :  { %692 = vperm.xlu1 %1331, %v499_v10   ;;  %v511_v11 = vpack.c.bf16 %v499_v10, %v496_v7 }
 0x260   :  { %1330 = vset.pattern.permute.xlu0 %v1594_v12  ;;  %1291 = vmatprep.mubr.msk.bf16.mxu1 %vm521_vm2, %v511_v11 }
 0x261   :  { %710 = vperm.xlu0 %1330, %v496_v7   ;;  %1292 = vmatmul.mubr.msk.bf16.vlgmr.msra.gmra.mrb[4].mxu1 %vm521_vm2, %v512_v9 }
 0x262   :  { %1332 = vset.pattern.permute.xlu1 %v1594_v12 }
 0x263   :  { %714 = vperm.xlu1 %1332, %v499_v10  }
 0x265   :  { %718 = vperm.xlu0 %1330, %v1287_v6  }
 0x267   :  { %1333 = vset.pattern.permute.xlu1 %v1593_v5  ;;  %v671_v5 = vsub.s32 1, %v654_v46 }
 0x268   :  { %697 = vperm.xlu1 %1333, %v1287_v6  }
 0x269   :  { %722 = vperm.xlu0 %1330, %v1288_v8  }
 0x26c   :  { %702 = vperm.xlu1 %1333, %v1288_v8  }
 0x26d   :  { %1335 = vset.pattern.permute.xlu0 %v1595_v31 }
 0x26e   :  { %857 = vperm.xlu0 %1335, %v1287_v6  }
 0x270   :  { %1334 = vset.pattern.permute.xlu1 %v1595_v31 }
 0x271   :  { %732 = vperm.xlu1 %1334, %v496_v7  }
 0x272   :  { %1336 = vset.pattern.permute.xlu0 %v1596_v13 }
 0x273   :  { %739 = vperm.xlu0 %1336, %v496_v7  }
 0x275   :  { %1337 = vset.pattern.permute.xlu1 %v1596_v13 }
 0x276   :  { %867 = vperm.xlu1 %1337, %v1287_v6  }
 0x277   :  { %931 = vperm.xlu0 %1336, %v1288_v8  }
 0x27a   :  { %1338 = vset.pattern.permute.xlu1 %v1595_v31 }
 0x27b   :  { %793 = vperm.xlu1 %1338, %v499_v10  }
 0x27f   :  { %1339 = vset.pattern.permute.xlu1 %v1596_v13  ;;  %v1849_v13 = vrot.slane %v652_v4, %v655_v60 }
 0x280   :  { %803 = vperm.xlu1 %1339, %v499_v10  }
 0x284   :  { %1340 = vset.pattern.permute.xlu1 %v1595_v31 }
 0x285   :  { %921 = vperm.xlu1 %1340, %v1288_v8  }
 0x2db   :  { %v1840_v54 = vpop.permute.xlu0 %687 }
 0x2dd   :  { %v1846_v9 = vpop.permute.xlu1 %692 }
 0x2e0   :  { %v711_v31 = vpop.permute.xlu0 %710 }
 0x334   :  { %v1293_v15 = vpop.f32.mrb[4].mxu1 }
 0x335   :  { %v565_v16 = vpop.f32.mrb[5].mxu1  ;;  %v1832_v47 = vadd.f32 %v1293_v15, %v1230_v14 }
 0x336   :  { %v1805_v17 = vadd.f32 %v1230_v14, %v565_v16  ;;  %v1294_v18 = vpop.f32.mrb[6].mxu1 }
 0x337   :  { %v1807_v19 = vadd.f32 %v1294_v18, %v1230_v14  ;;  %v568_v20 = vpop.f32.mrb[7].mxu1  ;;  %v594_v51 = vand.u32 2147483647, %v1832_v47  ;;  %v1852_v18 = vrot.slane %v652_v4, %v671_v5  ;;  %vm586_vm10 = vcmp.ne.f32.partialorder %v1832_v47, %v1832_v47 }
 0x338   :  { %v592_v21 = vand.u32 2147483647, %v1805_v17  ;;  %v1810_v22 = vadd.f32 %v1230_v14, %v568_v20  ;;  %v580_v10 = vmax.f32 %v1805_v17, 0.0  ;;  %vm584_vm5 = vcmp.ne.f32.partialorder %v1805_v17, %v1805_v17 }
 0x339   :  { %v595_v23 = vand.u32 2147483647, %v1807_v19  ;;  %v598_v3 = vsub.f32 0.0, %v594_v51  ;;  %v583_v15 = vmax.f32 %v1807_v19, 0.0  ;;  %vm587_vm6 = vcmp.ne.f32.partialorder %v1807_v19, %v1807_v19 }
 0x33a   :  { %v596_v24 = vsub.f32 0.0, %v592_v21  ;;  %v593_v25 = vand.u32 2147483647, %v1810_v22  ;;  %vm585_vm8 = vcmp.ne.f32.partialorder %v1810_v22, %v1810_v22 }
 0x33b   :  { %v599_v26 = vsub.f32 0.0, %v595_v23  ;;  %v604_v16 = vmul.f32 1.442695, %v598_v3 }
 0x33c   :  { %v600_v29 = vmul.f32 1.442695, %v596_v24  ;;  %v597_v32 = vsub.f32 0.0, %v593_v25 }
 0x33d   :  { %v606_v30 = vmul.f32 1.442695, %v599_v26  ;;  %v1862_v26 = vpop.permute.xlu1 %714 }
 0x33e   :  { %1397 = vpow2.f32 %v600_v29  ;;  %v602_v35 = vmul.f32 1.442695, %v597_v32 }
 0x33f   :  { %1399 = vpow2.f32 %v606_v30  ;;  %v1867_v30 = vpop.permute.xlu0 %718 }
 0x340   :  { %1401 = vpow2.f32 %v602_v35 }
 0x348   :  { %v1398_v40 = vpop.eup %1397 }
 0x349   :  { %v1400_v41 = vpop.eup %1399  ;;  %v608_v42 = vadd.f32 1.0, %v1398_v40  ;;  %v611_v48 = vmul.f32 -0.5, %v1398_v40  ;;  %v614_v56 = vand.u32 2147483647, %v1398_v40 }
 0x34a   :  { %v635_v43 = vadd.f32 1.0, %v1400_v41  ;;  %v1834_v49 = vpop.eup %1401  ;;  %v638_v36 = vmul.f32 -0.5, %v1400_v41  ;;  %v641_v0 = vand.u32 2147483647, %v1400_v41 }
 0x34b   :  { %1403 = vlog2.f32 %v608_v42  ;;  %v612_v55 = vadd.f32 1.0, %v611_v48  ;;  %v617_v53 = vadd.f32 1.0, %v1834_v49  ;;  %vm615_vm3 = vcmp.lt.f32.partialorder %v614_v56, 0.0004427343  ;;  %v1880_v42 = vpop.permute.xlu0 %722 }
 0x34c   :  { %1405 = vlog2.f32 %v635_v43  ;;  %v639_v58 = vadd.f32 1.0, %v638_v36  ;;  %vm642_vm4 = vcmp.lt.f32.partialorder %v641_v0, 0.0004427343  ;;  %v620_v29 = vmul.f32 -0.5, %v1834_v49 }
 0x34d   :  { %v613_v8 = vmul.f32 %v1398_v40, %v612_v55  ;;  %1407 = vlog2.f32 %v617_v53  ;;  %v623_v38 = vand.u32 2147483647, %v1834_v49  ;;  %v1878_v40 = vpop.permute.xlu1 %697  ;;  %v581_v48 = vmax.f32 %v1810_v22, 0.0 }
 0x34e   :  { %v640_v12 = vmul.f32 %v1400_v41, %v639_v58  ;;  %1409 = vpow2.f32 %v604_v16  ;;  %v621_v37 = vadd.f32 1.0, %v620_v29 }
 0x34f   :  { %vm624_vm7 = vcmp.lt.f32.partialorder %v623_v38, 0.0004427343  ;;  %v1886_v50 = vpop.permute.xlu0 %857 }
 0x350   :  { %v622_v43 = vmul.f32 %v1834_v49, %v621_v37 }
 0x351   :  { %v1884_v36 = vpop.permute.xlu1 %702 }
 0x353   :  { %v740_v5 = vpop.permute.xlu0 %739 }
 0x355   :  { %v1404_v1 = vpop.eup %1403  ;;  %v733_v3 = vpop.permute.xlu1 %732 }
 0x356   :  { %v1406_v6 = vpop.eup %1405  ;;  %v610_v7 = vmul.f32 0.6931472, %v1404_v1 }
 0x357   :  { %v637_v11 = vmul.f32 0.6931472, %v1406_v6  ;;  %v1408_v35 = vpop.eup %1407 }
 0x358   :  { %v616_v14 = vsel %vm615_vm3, %v613_v8, %v610_v7  ;;  %v619_v41 = vmul.f32 0.6931472, %v1408_v35  ;;  %v1410_v44 = vpop.eup %1409 }
 0x359   :  { %v644_v20 = vadd.f32 %v616_v14, %v580_v10  ;;  %v643_v21 = vsel %vm642_vm4, %v640_v12, %v637_v11  ;;  %v626_v46 = vadd.f32 1.0, %v1410_v44  ;;  %v632_v38 = vand.u32 2147483647, %v1410_v44 }
 0x35a   :  { %v647_v23 = vadd.f32 %v643_v21, %v583_v15  ;;  %v625_v45 = vsel %vm624_vm7, %v622_v43, %v619_v41 }
 0x35b   :  { %v648_v24 = vsel %vm584_vm5, %v1805_v17, %v644_v20  ;;  %v645_v51 = vadd.f32 %v625_v45, %v581_v48  ;;  %vm633_vm9 = vcmp.lt.f32.partialorder %v632_v38, 0.0004427343 }
 0x35c   :  { %v1860_v25 = vsel %vm587_vm6, %v1807_v19, %v647_v23  ;;  %v657_v27 = vmul.f32 %v1849_v13, %v648_v24  ;;  %v673_v28 = vmul.f32 %v1852_v18, %v648_v24  ;;  %v705_v56 = vmul.f32 %v1840_v54, %v648_v24 }
 0x35d   :  { %v1871_v32 = vmul.f32 %v1849_v13, %v1860_v25  ;;  %v1875_v17 = vmul.f32 %v1852_v18, %v1860_v25  ;;  %v725_v60 = vmul.f32 %v711_v31, %v648_v24  ;;  %v1893_v1 = vsel %vm585_vm8, %v1810_v22, %v645_v51 }
 0x35e   :  { %v661_v19 = vmul.f32 1.442695, %v657_v27  ;;  %v677_v33 = vmul.f32 1.442695, %v673_v28  ;;  %v658_v10 = vmul.f32 %v1849_v13, %v1893_v1  ;;  %v674_v12 = vmul.f32 %v1852_v18, %v1893_v1 }
 0x35f   :  { %v629_v22 = vmul.f32 -0.5, %v1410_v44 }
 0x360   :  { %1411 = vpow2.f32 %v661_v19  ;;  %v663_v20 = vmul.f32 1.442695, %v658_v10  ;;  %v679_v24 = vmul.f32 1.442695, %v674_v12  ;;  %v582_v10 = vmax.f32 %v1832_v47, 0.0 }
 0x361   :  { %1413 = vpow2.f32 %v677_v33  ;;  %v630_v33 = vadd.f32 1.0, %v629_v22 }
 0x362   :  { %1415 = vlog2.f32 %v626_v46  ;;  %v1899_v46 = vpop.permute.xlu1 %867 }
 0x363   :  { %1417 = vpow2.f32 %v1234_v59  ;;  %v631_v59 = vmul.f32 %v1410_v44, %v630_v33 }
 0x364   :  { %1419 = vpow2.f32 %v663_v20 }
 0x365   :  { %1421 = vpow2.f32 %v679_v24 }
 0x36a   :  { %v1412_v55 = vpop.eup %1411 }
 0x36b   :  { %v1414_v53 = vpop.eup %1413  ;;  %v729_v58 = vmul.f32 0.0, %v1412_v55 }
 0x36c   :  { %v736_v49 = vmul.f32 0.0, %v1414_v53  ;;  %v1416_v29 = vpop.eup %1415 }
 0x36d   :  { %v730_v0 = vadd.f32 %v729_v58, %v705_v56  ;;  %v1418_v43 = vpop.eup %1417  ;;  %v628_v45 = vmul.f32 0.6931472, %v1416_v29 }
 0x36e   :  { %v737_v4 = vadd.f32 %v736_v49, %v725_v60  ;;  %v1420_v44 = vpop.eup %1419 }
 0x36f   :  { %v735_v6 = vmul.f32 %v733_v3, %v730_v0  ;;  %v746_v7 = vrot.slane %v730_v0, 6 }
 0x370   :  { %v742_v54 = vmul.f32 %v740_v5, %v737_v4  ;;  %v752_v8 = vrot.slane %v737_v4, 6  ;;  %v1010_v4 = vadd.f32 1.0, %v1418_v43 }
 0x371   :  { %v748_v11 = vmul.f32 %v1412_v55, %v746_v7  ;;  %v634_v7 = vsel %vm633_vm9, %v631_v59, %v628_v45 }
 0x372   :  { %v743_v31 = vadd.f32 %v742_v54, %v735_v6  ;;  %v754_v14 = vmul.f32 %v1414_v53, %v752_v8  ;;  %1423 = vrcp.f32 %v1010_v4 }
 0x373   :  { %v749_v15 = vadd.f32 %v748_v11, %v705_v56 }
 0x374   :  { %744 = vst [vmem:[#allocation2] sm:$0x3] %v743_v31  ;;  %v755_v16 = vadd.f32 %v754_v14, %v725_v60  ;;  %v1902_v31 = vpop.permute.xlu1 %793  ;;  %v646_v14 = vadd.f32 %v634_v7, %v582_v10 }
 0x375   :  { %v750_v21 = vmul.f32 %v749_v15, %v733_v3  ;;  %v760_v23 = vrot.slane %v749_v15, 6 }
 0x376   :  { %v756_v27 = vmul.f32 %v755_v16, %v740_v5  ;;  %v766_v28 = vrot.slane %v755_v16, 6 }
 0x377   :  { %v762_v19 = vmul.f32 %v1412_v55, %v760_v23 }
 0x378   :  { %v757_v35 = vadd.f32 %v756_v27, %v750_v21  ;;  %v768_v37 = vmul.f32 %v1414_v53, %v766_v28  ;;  %v1422_v21 = vpop.eup %1421  ;;  %v804_v28 = vpop.permute.xlu1 %803 }
 0x379   :  { %v763_v41 = vadd.f32 %v762_v19, %v705_v56 }
 0x37a   :  { %758 = vst [vmem:[#allocation2] sm:$0xc] %v757_v35  ;;  %v769_v48 = vadd.f32 %v768_v37, %v725_v60  ;;  %v1914_v37 = vld [vmem:[#allocation11] ss:$0 sm:$0xff] }
 0x37b   :  { %v764_v51 = vmul.f32 %v763_v41, %v733_v3  ;;  %v774_v58 = vrot.slane %v763_v41, 6  ;;  %v990_v45 = vmul.f32 %v1914_v37, %v1791_v61 }
 0x37c   :  { %v770_v49 = vmul.f32 %v769_v48, %v740_v5  ;;  %v780_v0 = vrot.slane %v769_v48, 6 }
 0x37d   :  { %v776_v6 = vmul.f32 %v1412_v55, %v774_v58  ;;  %v1235_v55 = vmul.f32 -1.442695, %v1762_v39 }
 0x37e   :  { %v771_v54 = vadd.f32 %v770_v49, %v764_v51  ;;  %v782_v8 = vmul.f32 %v1414_v53, %v780_v0  ;;  %v706_v53 = vmul.f32 %v1846_v9, %v1893_v1 }
 0x37f   :  { %v777_v11 = vadd.f32 %v776_v6, %v705_v56  ;;  %1425 = vpow2.f32 %v1235_v55 }
 0x380   :  { %772 = vst [vmem:[#allocation2] sm:$0x30] %v771_v54  ;;  %v783_v12 = vadd.f32 %v782_v8, %v725_v60  ;;  %v726_v60 = vmul.f32 %v1862_v26, %v1893_v1 }
 0x381   :  { %v778_v15 = vmul.f32 %v777_v11, %v733_v3  ;;  %v788_v22 = vrot.slane %v777_v11, 6  ;;  %v650_v3 = vsel %vm586_vm10, %v1832_v47, %v646_v14  ;;  %v1424_v47 = vpop.eup %1423 }
 0x382   :  { %v784_v16 = vmul.f32 %v783_v12, %v740_v5  ;;  %v798_v20 = vrot.slane %v783_v12, 6  ;;  %v659_v9 = vmul.f32 %v1849_v13, %v650_v3  ;;  %v675_v38 = vmul.f32 %v1852_v18, %v650_v3 }
 0x383   :  { %v790_v23 = vmul.f32 %v1420_v44, %v788_v22  ;;  %v1022_v0 = vmul.f32 %v1424_v47, %v1756_v34 }
 0x384   :  { %v785_v56 = vadd.f32 %v784_v16, %v778_v15  ;;  %v800_v24 = vmul.f32 %v1422_v21, %v798_v20  ;;  %v665_v48 = vmul.f32 1.442695, %v659_v9  ;;  %v681_v58 = vmul.f32 1.442695, %v675_v38 }
 0x385   :  { %v791_v27 = vadd.f32 %v790_v23, %v706_v53 }
 0x386   :  { %786 = vst [vmem:[#allocation2] sm:$0xc0] %v785_v56  ;;  %v801_v5 = vadd.f32 %v800_v24, %v726_v60  ;;  %1427 = vpow2.f32 %v665_v48 }
 0x387   :  { %v796_v29 = vmul.f32 %v1902_v31, %v791_v27  ;;  %v810_v19 = vrot.slane %v791_v27, 6  ;;  %1429 = vpow2.f32 %v681_v58 }
 0x388   :  { %v806_v33 = vmul.f32 %v804_v28, %v801_v5  ;;  %v816_v35 = vrot.slane %v801_v5, 6 }
 0x389   :  { %v812_v26 = vmul.f32 %v1420_v44, %v810_v19  ;;  %v1426_v11 = vpop.eup %1425 }
 0x38a   :  { %v807_v1 = vadd.f32 %v806_v33, %v796_v29  ;;  %v818_v41 = vmul.f32 %v1422_v21, %v816_v35  ;;  %v1011_v34 = vadd.f32 1.0, %v1426_v11  ;;  %v707_v35 = vmul.f32 %v1878_v40, %v650_v3 }
 0x38b   :  { %v813_v43 = vadd.f32 %v812_v26, %v706_v53  ;;  %v1236_v26 = vmul.f32 -1.442695, %v1774_v52 }
 0x38c   :  { %808 = vst [vmem:[#allocation2 + $0x8] sm:$0x3] %v807_v1  ;;  %v819_v51 = vadd.f32 %v818_v41, %v726_v60  ;;  %1431 = vrcp.f32 %v1011_v34 }
 0x38d   :  { %v814_v13 = vmul.f32 %v813_v43, %v1902_v31  ;;  %v824_v59 = vrot.slane %v813_v43, 6  ;;  %v979_v49 = vld [vmem:[#allocation2] sm:$0xff]  ;;  %1433 = vpow2.f32 %v1236_v26 }
 0x38e   :  { %v820_v4 = vmul.f32 %v819_v51, %v804_v28  ;;  %v830_v18 = vrot.slane %v819_v51, 6  ;;  %v994_v6 = vadd.f32 %v990_v45, %v979_v49 }
 0x38f   :  { %v826_v7 = vmul.f32 %v1420_v44, %v824_v59 }
 0x390   :  { %v821_v54 = vadd.f32 %v820_v4, %v814_v13  ;;  %v832_v8 = vmul.f32 %v1422_v21, %v830_v18  ;;  %v1921_v10 = vmul.f32 %v1022_v0, %v994_v6  ;;  %v1428_v29 = vpop.eup %1427  ;;  %v683_v13 = vmul.f32 1.442695, %v1875_v17 }
 0x391   :  { %v827_v61 = vadd.f32 %v826_v7, %v706_v53  ;;  %v1430_v33 = vpop.eup %1429 }
 0x392   :  { %822 = vst [vmem:[#allocation2 + $0x8] sm:$0xc] %v821_v54  ;;  %v833_v12 = vadd.f32 %v832_v8, %v726_v60 }
 0x393   :  { %v828_v14 = vmul.f32 %v827_v61, %v1902_v31  ;;  %v838_v15 = vrot.slane %v827_v61, 6 }
 0x394   :  { %v834_v22 = vmul.f32 %v833_v12, %v804_v28  ;;  %v844_v16 = vrot.slane %v833_v12, 6 }
 0x395   :  { %v840_v20 = vmul.f32 %v1420_v44, %v838_v15  ;;  %v727_v44 = vmul.f32 %v1867_v30, %v650_v3  ;;  %v991_v30 = vmul.f32 %v1914_v37, %v1793_v62  ;;  %v667_v3 = vmul.f32 1.442695, %v1871_v32 }
 0x396   :  { %v835_v55 = vadd.f32 %v834_v22, %v828_v14  ;;  %v846_v23 = vmul.f32 %v1422_v21, %v844_v16  ;;  %v1432_v48 = vpop.eup %1431 }
 0x397   :  { %v841_v56 = vadd.f32 %v840_v20, %v706_v53  ;;  %v1023_v4 = vmul.f32 %v1432_v48, %v1762_v39  ;;  %1435 = vpow2.f32 %v667_v3  ;;  %v1434_v11 = vpop.eup %1433 }
 0x398   :  { %836 = vst [vmem:[#allocation2 + $0x8] sm:$0x30] %v835_v55  ;;  %v847_v24 = vadd.f32 %v846_v23, %v726_v60  ;;  %1437 = vpow2.f32 %v683_v13  ;;  %v1012_v16 = vadd.f32 1.0, %v1434_v11 }
 0x399   :  { %v842_v27 = vmul.f32 %v841_v56, %v1902_v31  ;;  %v852_v5 = vrot.slane %v841_v56, 6 }
 0x39a   :  { %v848_v19 = vmul.f32 %v847_v24, %v804_v28  ;;  %v862_v9 = vrot.slane %v847_v24, 6  ;;  %1439 = vrcp.f32 %v1012_v16  ;;  %v993_v16 = vmul.f32 %v1914_v37, %v1795_v63 }
 0x39b   :  { %v854_v38 = vmul.f32 %v1428_v29, %v852_v5 }
 0x39c   :  { %v849_v1 = vadd.f32 %v848_v19, %v842_v27  ;;  %v864_v21 = vmul.f32 %v1430_v33, %v862_v9 }
 0x39d   :  { %v855_v53 = vadd.f32 %v854_v38, %v707_v35  ;;  %v708_v38 = vmul.f32 %v1884_v36, %v1860_v25 }
 0x39e   :  { %850 = vst [vmem:[#allocation2 + $0x8] sm:$0xc0] %v849_v1  ;;  %v865_v60 = vadd.f32 %v864_v21, %v727_v44  ;;  %v922_v21 = vpop.permute.xlu1 %921 }
 0x39f   :  { %v860_v41 = vmul.f32 %v1886_v50, %v855_v53  ;;  %v874_v31 = vrot.slane %v855_v53, 6  ;;  %v932_v53 = vpop.permute.xlu0 %931 }
 0x3a0   :  { %v870_v28 = vmul.f32 %v1899_v46, %v865_v60  ;;  %v880_v47 = vrot.slane %v865_v60, 6 }
 0x3a1   :  { %v876_v43 = vmul.f32 %v1428_v29, %v874_v31  ;;  %v1436_v5 = vpop.eup %1435 }
 0x3a2   :  { %v871_v45 = vadd.f32 %v870_v28, %v860_v41  ;;  %v882_v40 = vmul.f32 %v1430_v33, %v880_v47  ;;  %v1438_v9 = vpop.eup %1437 }
 0x3a3   :  { %v877_v51 = vadd.f32 %v876_v43, %v707_v35 }
 0x3a4   :  { %872 = vst [vmem:[#allocation2 + $0x10] sm:$0x3] %v871_v45  ;;  %v883_v58 = vadd.f32 %v882_v40, %v727_v44  ;;  %v1440_v43 = vpop.eup %1439 }
 0x3a5   :  { %v878_v59 = vmul.f32 %v877_v51, %v1886_v50  ;;  %v888_v49 = vrot.slane %v877_v51, 6  ;;  %v980_v0 = vld [vmem:[#allocation2 + $0x8] sm:$0xff] }
 0x3a6   :  { %v884_v18 = vmul.f32 %v883_v58, %v1899_v46  ;;  %v894_v6 = vrot.slane %v883_v58, 6  ;;  %v995_v7 = vadd.f32 %v991_v30, %v980_v0  ;;  %v1024_v30 = vmul.f32 %v1440_v43, %v1774_v52 }
 0x3a7   :  { %v890_v54 = vmul.f32 %v1428_v29, %v888_v49 }
 0x3a8   :  { %v885_v8 = vadd.f32 %v884_v18, %v878_v59  ;;  %v896_v62 = vmul.f32 %v1430_v33, %v894_v6  ;;  %v1027_v61 = vmul.f32 %v1023_v4, %v995_v7 }
 0x3a9   :  { %v891_v32 = vadd.f32 %v890_v54, %v707_v35 }
 0x3aa   :  { %886 = vst [vmem:[#allocation2 + $0x10] sm:$0xc] %v885_v8  ;;  %v897_v17 = vadd.f32 %v896_v62, %v727_v44  ;;  %v1030_v12 = vpack.c.bf16 %v1027_v61, %v1921_v10 }
 0x3ab   :  { %v892_v14 = vmul.f32 %v891_v32, %v1886_v50  ;;  %v902_v15 = vrot.slane %v891_v32, 6 }
 0x3ac   :  { %v898_v39 = vmul.f32 %v897_v17, %v1899_v46  ;;  %v908_v22 = vrot.slane %v897_v17, 6  ;;  %1311 = vmatprep.mubr.bf16.mxu0 %v1030_v12 }
 0x3ad   :  { %v904_v34 = vmul.f32 %v1428_v29, %v902_v15  ;;  %v1237_v29 = vmul.f32 -1.442695, %v1777_v57 }
 0x3ae   :  { %v899_v20 = vadd.f32 %v898_v39, %v892_v14  ;;  %v910_v55 = vmul.f32 %v1430_v33, %v908_v22  ;;  %v728_v33 = vmul.f32 %v1880_v42, %v1860_v25  ;;  %v992_v25 = vmul.f32 %v1914_v37, %v1799_v2 }
 0x3af   :  { %v905_v23 = vadd.f32 %v904_v34, %v707_v35  ;;  %1441 = vpow2.f32 %v1237_v29 }
 0x3b0   :  { %900 = vst [vmem:[#allocation2 + $0x10] sm:$0x30] %v899_v20  ;;  %v911_v56 = vadd.f32 %v910_v55, %v727_v44 }
 0x3b1   :  { %v906_v24 = vmul.f32 %v905_v23, %v1886_v50  ;;  %v916_v27 = vrot.slane %v905_v23, 6 }
 0x3b2   :  { %v912_v10 = vmul.f32 %v911_v56, %v1899_v46  ;;  %v926_v19 = vrot.slane %v911_v56, 6 }
 0x3b3   :  { %v918_v26 = vmul.f32 %v1436_v5, %v916_v27 }
 0x3b4   :  { %v913_v35 = vadd.f32 %v912_v10, %v906_v24  ;;  %v928_v44 = vmul.f32 %v1438_v9, %v926_v19 }
 0x3b5   :  { %v919_v1 = vadd.f32 %v918_v26, %v708_v38 }
 0x3b6   :  { %v929_v50 = vadd.f32 %v928_v44, %v728_v33  ;;  %914 = vst [vmem:[#allocation2 + $0x10] sm:$0xc0] %v913_v35 }
 0x3b7   :  { %v924_v60 = vmul.f32 %v922_v21, %v919_v1  ;;  %v938_v46 = vrot.slane %v919_v1, 6 }
 0x3b8   :  { %v934_v41 = vmul.f32 %v932_v53, %v929_v50  ;;  %v944_v31 = vrot.slane %v929_v50, 6 }
 0x3b9   :  { %v940_v28 = vmul.f32 %v1436_v5, %v938_v46  ;;  %v1442_v6 = vpop.eup %1441 }
 0x3ba   :  { %v946_v36 = vmul.f32 %v1438_v9, %v944_v31  ;;  %v935_v47 = vadd.f32 %v934_v41, %v924_v60  ;;  %v1013_v61 = vadd.f32 1.0, %v1442_v6 }
 0x3bb   :  { %v941_v45 = vadd.f32 %v940_v28, %v708_v38 }
 0x3bc   :  { %936 = vst [vmem:[#allocation2 + $0x18] sm:$0x3] %v935_v47  ;;  %v947_v42 = vadd.f32 %v946_v36, %v728_v33  ;;  %1443 = vrcp.f32 %v1013_v61 }
 0x3bd   :  { %v942_v40 = vmul.f32 %v941_v45, %v922_v21  ;;  %v952_v48 = vrot.slane %v941_v45, 6  ;;  %v981_v51 = vld [vmem:[#allocation2 + $0x10] sm:$0xff] }
 0x3be   :  { %v948_v3 = vmul.f32 %v947_v42, %v932_v53  ;;  %v958_v58 = vrot.slane %v947_v42, 6  ;;  %v996_v13 = vadd.f32 %v992_v25, %v981_v51 }
 0x3bf   :  { %v954_v59 = vmul.f32 %v1436_v5, %v952_v48 }
 0x3c0   :  { %v949_v49 = vadd.f32 %v948_v3, %v942_v40  ;;  %v960_v0 = vmul.f32 %v1438_v9, %v958_v58  ;;  %v1028_v4 = vmul.f32 %v1024_v30, %v996_v13 }
 0x3c1   :  { %v955_v18 = vadd.f32 %v954_v59, %v708_v38 }
 0x3c2   :  { %950 = vst [vmem:[#allocation2 + $0x18] sm:$0xc] %v949_v49  ;;  %v961_v7 = vadd.f32 %v960_v0, %v728_v33 }
 0x3c3   :  { %v956_v54 = vmul.f32 %v955_v18, %v922_v21  ;;  %v966_v2 = vrot.slane %v955_v18, 6 }
 0x3c4   :  { %v962_v8 = vmul.f32 %v961_v7, %v932_v53  ;;  %v972_v62 = vrot.slane %v961_v7, 6 }
 0x3c5   :  { %v968_v32 = vmul.f32 %v1436_v5, %v966_v2 }
 0x3c6   :  { %v963_v11 = vadd.f32 %v962_v8, %v956_v54  ;;  %v974_v17 = vmul.f32 %v1438_v9, %v972_v62  ;;  %v1444_v22 = vpop.eup %1443 }
 0x3c7   :  { %v969_v52 = vadd.f32 %v968_v32, %v708_v38  ;;  %v1025_v20 = vmul.f32 %v1444_v22, %v1777_v57 }
 0x3c8   :  { %964 = vst [vmem:[#allocation2 + $0x18] sm:$0x30] %v963_v11  ;;  %v975_v12 = vadd.f32 %v974_v17, %v728_v33 }
 0x3c9   :  { %v970_v14 = vmul.f32 %v969_v52, %v922_v21 }
 0x3ca   :  { %v976_v15 = vmul.f32 %v975_v12, %v932_v53 }
 0x3cc   :  { %v977_v39 = vadd.f32 %v976_v15, %v970_v14 }
 0x3ce   :  { %978 = vst [vmem:[#allocation2 + $0x18] sm:$0xc0] %v977_v39 }
 0x3d5   :  { %v982_v34 = vld [vmem:[#allocation2 + $0x18] sm:$0xff] }
 0x3d6   :  { %v997_v55 = vadd.f32 %v993_v16, %v982_v34 }
 0x3d8   :  { %v1029_v23 = vmul.f32 %v1025_v20, %v997_v55 }
 0x3da   :  { %v1031_v56 = vpack.c.bf16 %v1029_v23, %v1028_v4 }
 0x3dc   :  { %1312 = vmatmul.mubr.bf16.vlgmr.msra.gmra.mrb[8].mxu0 %v1031_v56 }
 0x4af   :  { %v1313_v24 = vpop.f32.mrb[8].mxu0 }
 0x4b0   :  { %1162 = vst [vmem:[#allocation12 + $0x8] sm:$0x1] %v1313_v24  ;;  %1163 = vst [vmem:[#allocation12 + $0x17] sm:$0x2] %v1313_v24  ;;  %v1130_v27 = vpop.f32.mrb[9].mxu0 }
 0x4b1   :  { %1164 = vst [vmem:[#allocation12 + $0x7] sm:$0x4] %v1313_v24  ;;  %1165 = vst [vmem:[#allocation12 + $0x16] sm:$0x8] %v1313_v24  ;;  %v1314_v57 = vpop.f32.mrb[10].mxu0 }
 0x4b2   :  { %1166 = vst [vmem:[#allocation12 + $0x6] sm:$0x10] %v1313_v24  ;;  %1167 = vst [vmem:[#allocation12 + $0x15] sm:$0x20] %v1313_v24  ;;  %v1133_v63 = vpop.f32.mrb[11].mxu0 }
 0x4b3   :  { %1168 = vst [vmem:[#allocation12 + $0x5] sm:$0x40] %v1313_v24  ;;  %1169 = vst [vmem:[#allocation12 + $0x14] sm:$0x80] %v1313_v24 }
 0x4b4   :  { %1145 = vst [vmem:[#allocation12] sm:$0x1] %v1130_v27  ;;  %1147 = vst [vmem:[#allocation12 + $0xf] sm:$0x2] %v1130_v27 }
 0x4b5   :  { %1148 = vst [vmem:[#allocation12 - $0x1] sm:$0x4] %v1130_v27  ;;  %1149 = vst [vmem:[#allocation12 + $0xe] sm:$0x8] %v1130_v27 }
 0x4b6   :  { %1150 = vst [vmem:[#allocation12 - $0x2] sm:$0x10] %v1130_v27  ;;  %1151 = vst [vmem:[#allocation12 + $0xd] sm:$0x20] %v1130_v27 }
 0x4b7   :  { %1152 = vst [vmem:[#allocation12 - $0x3] sm:$0x40] %v1130_v27  ;;  %1153 = vst [vmem:[#allocation12 + $0xc] sm:$0x80] %v1130_v27 }
 0x4b8   :  { %1170 = vst [vmem:[#allocation12 + $0xc] sm:$0x1] %v1314_v57  ;;  %1171 = vst [vmem:[#allocation12 + $0x1b] sm:$0x2] %v1314_v57 }
 0x4b9   :  { %1172 = vst [vmem:[#allocation12 + $0xb] sm:$0x4] %v1314_v57  ;;  %1173 = vst [vmem:[#allocation12 + $0x1a] sm:$0x8] %v1314_v57 }
 0x4ba   :  { %1174 = vst [vmem:[#allocation12 + $0xa] sm:$0x10] %v1314_v57  ;;  %1175 = vst [vmem:[#allocation12 + $0x19] sm:$0x20] %v1314_v57 }
 0x4bb   :  { %1176 = vst [vmem:[#allocation12 + $0x9] sm:$0x40] %v1314_v57  ;;  %1177 = vst [vmem:[#allocation12 + $0x18] sm:$0x80] %v1314_v57 }
 0x4bc   :  { %1154 = vst [vmem:[#allocation12 + $0x4] sm:$0x1] %v1133_v63  ;;  %1155 = vst [vmem:[#allocation12 + $0x13] sm:$0x2] %v1133_v63 }
 0x4bd   :  { %1156 = vst [vmem:[#allocation12 + $0x3] sm:$0x4] %v1133_v63  ;;  %1157 = vst [vmem:[#allocation12 + $0x12] sm:$0x8] %v1133_v63 }
 0x4be   :  { %1158 = vst [vmem:[#allocation12 + $0x2] sm:$0x10] %v1133_v63  ;;  %1159 = vst [vmem:[#allocation12 + $0x11] sm:$0x20] %v1133_v63 }
 0x4bf   :  { %1160 = vst [vmem:[#allocation12 + $0x1] sm:$0x40] %v1133_v63  ;;  %1161 = vst [vmem:[#allocation12 + $0x10] sm:$0x80] %v1133_v63 }
 0x4c0   :  { %1566 = shalt.err (!%p1563_p2)
}
 0x4c1   :  { %s1567_s15 = scalar_lea.hbm %s1985_s10, 512 }
 0x4c2   :  { %p1568_p3 = scmp.ne.s32.totalorder %s1985_s10, %s1567_s15  ;;  %p1571_p4 = scmp.lt.u32.totalorder %s1567_s15, %s1985_s10 }
 0x4c4   :  { %p1573_p5 = pnand %p1571_p4, %p1568_p3 }
 0x4c6   :  { %1576 = shalt.err (!%p1573_p5)
}
 0x4c7   :  { %1189 = dma.vmem_to_hbm [thread:$0]  %s1953_s30, 512, %s1985_s10, [#allocation5], %s1588_s7, %s1588_s7, %s1589_s16  }
 0x4c8   :  { %1583 = dma.done.wait [#allocation5], 512  }
 0x4c9   :  { %1584 = vsyncadd [#allocation5], 4294966784 }
 0x4ca   :  { %1193 = vsyncpa [#allocation4], 1 }
 0x4cb   :  { %1194 = vsyncpa [#allocation7], 1 }
 0x4cc   :  { %1195 = vsyncpa [#allocation10], 1 }
 0x4cd   :  { %1196 = vsyncpa [#allocation5], 1 }

</bundles_post_ra>
